<compile_context>
chip_gen: v6e
topology: v6e:2x2x1
jax: 0.10.0
libtpu: 0.0.40
codegen_flags: <defaults>
</compile_context>

<pallas_src>
import jax
import jax.numpy as jnp
from jax.experimental import pallas as pl
from jax.experimental.pallas import tpu as pltpu

SCALE = 4.0     # InputEmbedding scale
NP = 8          # Hidden2Normal output padded from 5 -> 8 lanes
BF16 = jnp.bfloat16


def _cspec(a):
    """Full-array block with a constant index map (resident after one DMA)."""
    zeros = (0,) * a.ndim
    return pl.BlockSpec(a.shape, lambda t, _z=zeros: _z)


# ----------------------------------------------------------------------------
# Fully fused eval forward: obs recurrence + VAE noise injection + decoder
# ----------------------------------------------------------------------------
def _vae_fused_call(p, observed, is_primary, eps, n_predict):
    obs_len, N, _ = observed.shape
    T_obs = obs_len - 1
    T_dec = n_predict - 1
    T_total = T_obs + T_dec
    H = p['w_hh'].shape[1]
    L = p['dec_w'].shape[0]
    L2 = 2 * L

    # Hidden2Normal squash coefficients (hoisted out of the recurrence):
    #   n_sq = raw * n + off + scale * sigmoid(n)
    # lanes: [mu_x, mu_y, sigma_x, sigma_y, rho, pad, pad, pad]
    coef = jnp.array(
        [[1.0, 1.0, 0.00, 0.00, 0.0, 0.0, 0.0, 0.0],
         [0.0, 0.0, 0.01, 0.01, 0.0, 0.0, 0.0, 0.0],
         [0.0, 0.0, 0.20, 0.20, 0.7, 0.0, 0.0, 0.0]], dtype=jnp.float32)

    def kernel(obs_ref, prim_ref, eps_ref, coef_ref,
               emb_w_ref, emb_b_ref, w_hh_ref, w_ih_ref, b_g_ref,
               h2n_w_ref, h2n_b_ref,
               enc_w_ref, enc_b_ref, dec_w_ref, dec_b_ref,
               nwh_ref, nwx_ref, nb_ref,
               n_out_ref, p_out_ref, z_out_ref,
               h_sc, c_sc, pos_sc):
        t = pl.program_id(0)

        @pl.when(t == 0)
        def _():
            h_sc[...] = jnp.zeros_like(h_sc)
            c_sc[...] = jnp.zeros_like(c_sc)
            pos_sc[...] = jnp.zeros_like(pos_sc)

        # --- VAEEncoder (fc_mu|fc_var) + add_noise, once, before first decode step
        @pl.when(t == T_obs)
        def _():
            h_obs = h_sc[...]
            # Reference VAEEncoder applies ReLU to both heads (kept as-is).
            mv = jnp.maximum(
                jnp.dot(h_obs.astype(BF16), enc_w_ref[...],
                        preferred_element_type=jnp.float32) + enc_b_ref[...], 0.0)
            z_out_ref[...] = mv                       # z_distr_x = [mu | logvar]
            mu = mv[:, :L]
            logvar = mv[:, L:]
            z_val = mu + jnp.exp(0.5 * logvar) * eps_ref[...]
            x_rec = jnp.maximum(
                jnp.dot(z_val.astype(BF16), dec_w_ref[...],
                        preferred_element_type=jnp.float32) + dec_b_ref[...], 0.0)
            # noise_linear(cat([h_obs, x_rec])) as two aligned matmuls
            h_sc[...] = (
                jnp.dot(h_obs.astype(BF16), nwh_ref[...],
                        preferred_element_type=jnp.float32)
                + jnp.dot(x_rec.astype(BF16), nwx_ref[...],
                          preferred_element_type=jnp.float32)
                + nb_ref[...])

        # --- select this step's (obs1, obs2) and which LSTMCell to use
        is_obs = t < T_obs
        phase = (t >= T_obs).astype(jnp.int32)        # 0 = obs_encoder, 1 = decoder
        t_c = jnp.minimum(t, T_obs - 1)               # clamp for decode-phase safety
        obs_a = obs_ref[t_c]                          # observed[t]   (obs phase)
        obs_b = obs_ref[t_c + 1]                      # observed[t+1] / observed[-1]

        p_prev2 = pos_sc[0]                           # positions[-2]
        p_prev1 = pos_sc[1]                           # positions[-1]
        # decode step 0: obs1 = observed[-1] with primary rows <- positions[-2]
        # decode step>0: obs1 = positions[-2];  obs2 = positions[-1] always (eval)
        use_hist = jnp.logical_or(t > T_obs, prim_ref[...] > 0.5)     # (N,1)
        dec_obs1 = jnp.where(use_hist, p_prev2, obs_b)
        obs1 = jnp.where(is_obs, obs_a, dec_obs1)
        obs2 = jnp.where(is_obs, obs_b, p_prev1)

        # track_mask: both x-coordinates non-NaN (matches reference)
        mask = jnp.logical_not(jnp.isnan(obs1[:, 0:1]) | jnp.isnan(obs2[:, 0:1]))

        # InputEmbedding: relu(Linear(2,E)(velocity * scale))
        vel = (obs2 - obs1) * SCALE
        emb = jnp.maximum(
            jnp.dot(vel.astype(BF16), emb_w_ref[...],
                    preferred_element_type=jnp.float32) + emb_b_ref[...], 0.0)

        # LSTMCell: gates = h @ w_hh + emb @ w_ih + b   (gate order i, f, g, o)
        h = h_sc[...]
        c = c_sc[...]
        gates = (jnp.dot(h.astype(BF16), w_hh_ref[phase],
                         preferred_element_type=jnp.float32)
                 + jnp.dot(emb.astype(BF16), w_ih_ref[phase],
                           preferred_element_type=jnp.float32)
                 + b_g_ref[phase])
        i_g = jax.nn.sigmoid(gates[:, 0 * H:1 * H])
        f_g = jax.nn.sigmoid(gates[:, 1 * H:2 * H])
        g_g = jnp.tanh(gates[:, 2 * H:3 * H])
        o_g = jax.nn.sigmoid(gates[:, 3 * H:4 * H])
        c_new = f_g * c + i_g * g_g
        h_new = o_g * jnp.tanh(c_new)

        # Hidden2Normal (padded to NP lanes), squash via hoisted coefficients
        n = (jnp.dot(h_new.astype(BF16), h2n_w_ref[...],
                     preferred_element_type=jnp.float32) + h2n_b_ref[...])
        cf = coef_ref[...]
        n_sq = cf[0:1] * n + cf[1:2] + cf[2:3] * jax.nn.sigmoid(n)

        n_masked = jnp.where(mask, n_sq, jnp.nan)
        pos_new = obs2 + n_masked[:, :2]

        # masked state update + rolling two-position history
        h_sc[...] = jnp.where(mask, h_new, h)
        c_sc[...] = jnp.where(mask, c_new, c)
        pos_sc[0] = p_prev1
        pos_sc[1] = pos_new

        # resident output slabs: one row per grid step, written back once at end
        n_out_ref[t] = n_masked
        p_out_ref[t] = pos_new

    args = (observed, is_primary, eps, coef,
            p['emb_w'], p['emb_b'], p['w_hh'], p['w_ih'], p['b_g'],
            p['h2n_w'], p['h2n_b'],
            p['enc_w'], p['enc_b'], p['dec_w'], p['dec_b'],
            p['noise_w_h'], p['noise_w_x'], p['noise_b'])

    out_shape = (
        jax.ShapeDtypeStruct((T_total, N, NP), jnp.float32),
        jax.ShapeDtypeStruct((T_total, N, 2), jnp.float32),
        jax.ShapeDtypeStruct((N, L2), jnp.float32),
    )
    out_specs = (
        pl.BlockSpec((T_total, N, NP), lambda t: (0, 0, 0)),
        pl.BlockSpec((T_total, N, 2), lambda t: (0, 0, 0)),
        pl.BlockSpec((N, L2), lambda t: (0, 0)),
    )
    scratch_shapes = [
        pltpu.VMEM((N, H), jnp.float32),       # hidden state
        pltpu.VMEM((N, H), jnp.float32),       # cell state
        pltpu.VMEM((2, N, 2), jnp.float32),    # last two predicted positions
    ]
    # TODO(synk): for large track counts add a leading "parallel" grid axis over
    # N-tiles (v7x megacore) and pl.Buffered(1) on the constant weight inputs.
    return pl.pallas_call(
        kernel,
        grid=(T_total,),
        out_shape=out_shape,
        in_specs=[_cspec(a) for a in args],
        out_specs=out_specs,
        scratch_shapes=scratch_shapes,
        compiler_params=pltpu.CompilerParams(dimension_semantics=("arbitrary",)),
    )(*args)


# ----------------------------------------------------------------------------
# Parameter construction (deterministic, synthetic)
# ----------------------------------------------------------------------------
def init_params(key, embedding_dim=64, hidden_dim=128, latent_dim=128):
    E, H, L = embedding_dim, hidden_dim, latent_dim

    def mk(k, shape, fan_in, dtype=jnp.float32):
        bound = 1.0 / jnp.sqrt(fan_in)
        return jax.random.uniform(k, shape, jnp.float32, -bound, bound).astype(dtype)

    keys = jax.random.split(key, 20)
    p = {}
    # shared InputEmbedding (2 -> E) and Hidden2Normal (H -> 5, padded to NP lanes)
    p['emb_w'] = mk(keys[0], (2, E), 2, BF16)
    p['emb_b'] = mk(keys[1], (1, E), 2)
    h2n_w = jnp.zeros((H, NP), jnp.float32).at[:, :5].set(mk(keys[2], (H, 5), H))
    p['h2n_w'] = h2n_w.astype(BF16)
    p['h2n_b'] = jnp.zeros((1, NP), jnp.float32).at[:, :5].set(mk(keys[3], (1, 5), H))
    # stacked LSTMCells: index 0 = obs_encoder, 1 = decoder.
    # w_hh acts on h (= w_hh^T), w_ih acts on the input embedding (= w_ih^T),
    # bias = b_ih + b_hh.  Gate order i, f, g, o.
    p['w_hh'] = jnp.stack([mk(keys[4], (H, 4 * H), H),
                           mk(keys[5], (H, 4 * H), H)]).astype(BF16)
    p['w_ih'] = jnp.stack([mk(keys[6], (E, 4 * H), H),
                           mk(keys[7], (E, 4 * H), H)]).astype(BF16)
    p['b_g'] = jnp.stack([mk(keys[8], (1, 4 * H), H),
                          mk(keys[9], (1, 4 * H), H)])
    # vae_encoder_x: fc_mu and fc_var fused into one (H, 2L) weight
    p['enc_w'] = jnp.concatenate([mk(keys[10], (H, L), H),
                                  mk(keys[11], (H, L), H)], axis=1).astype(BF16)
    p['enc_b'] = jnp.concatenate([mk(keys[12], (1, L), H),
                                  mk(keys[13], (1, L), H)], axis=1)
    # vae_decoder: Linear(L -> H) + ReLU
    p['dec_w'] = mk(keys[14], (L, H), L, BF16)
    p['dec_b'] = mk(keys[15], (1, H), L)
    # noise_linear: Linear(2H -> H) split into the h part and the x_reconstr part
    p['noise_w_h'] = mk(keys[16], (H, H), 2 * H, BF16)
    p['noise_w_x'] = mk(keys[17], (H, H), 2 * H, BF16)
    p['noise_b'] = mk(keys[18], (1, H), 2 * H)
    p['noise_key'] = jax.random.fold_in(key, 123)
    return p


# ----------------------------------------------------------------------------
# Full eval-mode VAE.forward (num_modes=1, pool=None, goal_flag=False,
# trajectron approach, noise_approach='default' -> concat + noise_linear)
# ----------------------------------------------------------------------------
def vae_forward(params, observed, goals, batch_split, n_predict):
    del goals  # goal_flag=False on the eval path
    obs_len, N, _ = observed.shape
    assert obs_len >= 3 and n_predict >= 2
    L = params['dec_w'].shape[0]

    # TODO(synk): eps could be generated in-kernel via pltpu.prng_seed +
    # pltpu.stateful_normal; kept as a single tiny host input for determinism.
    eps = jax.random.normal(params['noise_key'], (N, L), jnp.float32)
    is_primary = jnp.zeros((N, 1), jnp.float32).at[batch_split[:-1], 0].set(1.0)

    slab_n, slab_p, z_distr_x = _vae_fused_call(
        params, observed, is_primary, eps, n_predict)

    normals = slab_n[:, :, :5]
    positions = slab_p
    rel_pred_scene = [normals]      # one mode
    pred_scene = [positions]
    z_distr_xy = None               # training-only
    return rel_pred_scene, pred_scene, z_distr_xy, z_distr_x


if __name__ == "__main__":
    key = jax.random.PRNGKey(0)
    k_param, k_obs, k_goal = jax.random.split(key, 3)

    obs_len, num_tracks, n_predict = 4, 8, 3
    embedding_dim, hidden_dim, latent_dim = 64, 128, 128
    params = init_params(k_param, embedding_dim=embedding_dim,
                         hidden_dim=hidden_dim, latent_dim=latent_dim)

    observed = jax.random.normal(k_obs, (obs_len, num_tracks, 2), jnp.float32)
    goals = jax.random.normal(k_goal, (num_tracks, 2), jnp.float32)
    batch_split = jnp.array([0, 4, 8], dtype=jnp.int32)  # 2 scenes, 4 tracks each

    forward = jax.jit(vae_forward, static_argnames=("n_predict",))
    rel_pred_scene, pred_scene, z_distr_xy, z_distr_x = forward(
        params, observed, goals, batch_split, n_predict=n_predict)

    jax.block_until_ready(rel_pred_scene[0])
    jax.block_until_ready(pred_scene[0])
    jax.block_until_ready(z_distr_x)

    T_total = (obs_len - 1) + (n_predict - 1)
    assert rel_pred_scene[0].shape == (T_total, num_tracks, 5)
    assert pred_scene[0].shape == (T_total, num_tracks, 2)
    assert z_distr_x.shape == (num_tracks, 2 * latent_dim)
    assert z_distr_xy is None
    assert bool(jnp.all(jnp.isfinite(pred_scene[0])))
    assert bool(jnp.all(jnp.isfinite(rel_pred_scene[0])))
    assert bool(jnp.all(jnp.isfinite(z_distr_x)))

    print("KERNEL_OK")
</pallas_src>

<mosaic_0001>
module attributes {stable_mosaic.version = 11 : i64} {
  func.func @kernel(%arg0: i32, %arg1: memref<4x8x2xf32, #tpu.memory_space<vmem>>, %arg2: memref<8x1xf32, #tpu.memory_space<vmem>>, %arg3: memref<8x128xf32, #tpu.memory_space<vmem>>, %arg4: memref<3x8xf32, #tpu.memory_space<vmem>>, %arg5: memref<2x64xbf16, #tpu.memory_space<vmem>>, %arg6: memref<1x64xf32, #tpu.memory_space<vmem>>, %arg7: memref<2x128x512xbf16, #tpu.memory_space<vmem>>, %arg8: memref<2x64x512xbf16, #tpu.memory_space<vmem>>, %arg9: memref<2x1x512xf32, #tpu.memory_space<vmem>>, %arg10: memref<128x8xbf16, #tpu.memory_space<vmem>>, %arg11: memref<1x8xf32, #tpu.memory_space<vmem>>, %arg12: memref<128x256xbf16, #tpu.memory_space<vmem>>, %arg13: memref<1x256xf32, #tpu.memory_space<vmem>>, %arg14: memref<128x128xbf16, #tpu.memory_space<vmem>>, %arg15: memref<1x128xf32, #tpu.memory_space<vmem>>, %arg16: memref<128x128xbf16, #tpu.memory_space<vmem>>, %arg17: memref<128x128xbf16, #tpu.memory_space<vmem>>, %arg18: memref<1x128xf32, #tpu.memory_space<vmem>>, %arg19: memref<5x8x8xf32, #tpu.memory_space<vmem>>, %arg20: memref<5x8x2xf32, #tpu.memory_space<vmem>>, %arg21: memref<8x256xf32, #tpu.memory_space<vmem>>, %arg22: memref<8x128xf32, #tpu.memory_space<vmem>>, %arg23: memref<8x128xf32, #tpu.memory_space<vmem>>, %arg24: memref<2x8x2xf32, #tpu.memory_space<vmem>>) attributes {dimension_semantics = [#tpu.dimension_semantics<arbitrary>], iteration_bounds = array<i64: 5>, scalar_prefetch = 0 : i64, scratch_operands = 3 : i64, tpu.core_type = #tpu.core_type<tc>, window_params = [{pipeline_mode = #tpu.pipeline_mode<synchronous>, transform_indices = @transform_0, window_bounds = array<i64: 4, 8, 2>}, {pipeline_mode = #tpu.pipeline_mode<synchronous>, transform_indices = @transform_1, window_bounds = array<i64: 8, 1>}, {pipeline_mode = #tpu.pipeline_mode<synchronous>, transform_indices = @transform_2, window_bounds = array<i64: 8, 128>}, {pipeline_mode = #tpu.pipeline_mode<synchronous>, transform_indices = @transform_3, window_bounds = array<i64: 3, 8>}, {pipeline_mode = #tpu.pipeline_mode<synchronous>, transform_indices = @transform_4, window_bounds = array<i64: 2, 64>}, {pipeline_mode = #tpu.pipeline_mode<synchronous>, transform_indices = @transform_5, window_bounds = array<i64: 1, 64>}, {pipeline_mode = #tpu.pipeline_mode<synchronous>, transform_indices = @transform_6, window_bounds = array<i64: 2, 128, 512>}, {pipeline_mode = #tpu.pipeline_mode<synchronous>, transform_indices = @transform_7, window_bounds = array<i64: 2, 64, 512>}, {pipeline_mode = #tpu.pipeline_mode<synchronous>, transform_indices = @transform_8, window_bounds = array<i64: 2, 1, 512>}, {pipeline_mode = #tpu.pipeline_mode<synchronous>, transform_indices = @transform_9, window_bounds = array<i64: 128, 8>}, {pipeline_mode = #tpu.pipeline_mode<synchronous>, transform_indices = @transform_10, window_bounds = array<i64: 1, 8>}, {pipeline_mode = #tpu.pipeline_mode<synchronous>, transform_indices = @transform_11, window_bounds = array<i64: 128, 256>}, {pipeline_mode = #tpu.pipeline_mode<synchronous>, transform_indices = @transform_12, window_bounds = array<i64: 1, 256>}, {pipeline_mode = #tpu.pipeline_mode<synchronous>, transform_indices = @transform_13, window_bounds = array<i64: 128, 128>}, {pipeline_mode = #tpu.pipeline_mode<synchronous>, transform_indices = @transform_14, window_bounds = array<i64: 1, 128>}, {pipeline_mode = #tpu.pipeline_mode<synchronous>, transform_indices = @transform_15, window_bounds = array<i64: 128, 128>}, {pipeline_mode = #tpu.pipeline_mode<synchronous>, transform_indices = @transform_16, window_bounds = array<i64: 128, 128>}, {pipeline_mode = #tpu.pipeline_mode<synchronous>, transform_indices = @transform_17, window_bounds = array<i64: 1, 128>}, {pipeline_mode = #tpu.pipeline_mode<synchronous>, transform_indices = @transform_18, window_bounds = array<i64: 5, 8, 8>}, {pipeline_mode = #tpu.pipeline_mode<synchronous>, transform_indices = @transform_19, window_bounds = array<i64: 5, 8, 2>}, {pipeline_mode = #tpu.pipeline_mode<synchronous>, transform_indices = @transform_20, window_bounds = array<i64: 8, 256>}]} {
    %c0_i32 = arith.constant 0 : i32
    %0 = arith.cmpi eq, %arg0, %c0_i32 : i32
    %1 = arith.extui %0 : i1 to i32
    %c0_i32_0 = arith.constant 0 : i32
    %2 = arith.cmpi ne, %1, %c0_i32_0 : i32
    scf.if %2 {
      %cst_61 = arith.constant 0.000000e+00 : f32
      %142 = vector.broadcast %cst_61 : f32 to vector<8x128xf32>
      %c0_62 = arith.constant 0 : index
      %c0_63 = arith.constant 0 : index
      %143 = vector.load %arg22[%c0_62, %c0_63] : memref<8x128xf32, #tpu.memory_space<vmem>>, vector<8x128xf32>
      tpu.vector_store %arg22[%c0_62, %c0_63], %142 {strides = array<i32>} : memref<8x128xf32, #tpu.memory_space<vmem>>, vector<8x128xf32>,
      %cst_64 = arith.constant 0.000000e+00 : f32
      %144 = vector.broadcast %cst_64 : f32 to vector<8x128xf32>
      %c0_65 = arith.constant 0 : index
      %c0_66 = arith.constant 0 : index
      %145 = vector.load %arg23[%c0_65, %c0_66] : memref<8x128xf32, #tpu.memory_space<vmem>>, vector<8x128xf32>
      tpu.vector_store %arg23[%c0_65, %c0_66], %144 {strides = array<i32>} : memref<8x128xf32, #tpu.memory_space<vmem>>, vector<8x128xf32>,
      %cst_67 = arith.constant 0.000000e+00 : f32
      %146 = vector.broadcast %cst_67 : f32 to vector<2x8x2xf32>
      %c0_68 = arith.constant 0 : index
      %c0_69 = arith.constant 0 : index
      %c0_70 = arith.constant 0 : index
      %147 = vector.load %arg24[%c0_68, %c0_69, %c0_70] : memref<2x8x2xf32, #tpu.memory_space<vmem>>, vector<2x8x2xf32>
      tpu.vector_store %arg24[%c0_68, %c0_69, %c0_70], %146 {strides = array<i32>} : memref<2x8x2xf32, #tpu.memory_space<vmem>>, vector<2x8x2xf32>,
    } else {
    }
    %c3_i32 = arith.constant 3 : i32
    %3 = arith.cmpi eq, %arg0, %c3_i32 : i32
    %4 = arith.extui %3 : i1 to i32
    %c0_i32_1 = arith.constant 0 : i32
    %5 = arith.cmpi ne, %4, %c0_i32_1 : i32
    scf.if %5 {
      %c0_61 = arith.constant 0 : index
      %c0_62 = arith.constant 0 : index
      %142 = vector.load %arg22[%c0_61, %c0_62] : memref<8x128xf32, #tpu.memory_space<vmem>>, vector<8x128xf32>
      %143 = arith.truncf %142 : vector<8x128xf32> to vector<8x128xbf16>
      %c0_63 = arith.constant 0 : index
      %c0_64 = arith.constant 0 : index
      %144 = vector.load %arg12[%c0_63, %c0_64] : memref<128x256xbf16, #tpu.memory_space<vmem>>, vector<128x256xbf16>
      %cst_65 = arith.constant dense<0.000000e+00> : vector<8x256xf32>
      %145 = tpu.matmul %143, %144, %cst_65 {dimension_numbers = #tpu.dot_dimension_numbers<[1], [0], [0], [1], [0, 0, 1, 1], [], []>} : vector<8x128xbf16>, vector<128x256xbf16>, vector<8x256xf32> -> vector<8x256xf32>
      %c0_66 = arith.constant 0 : index
      %c0_67 = arith.constant 0 : index
      %146 = vector.load %arg13[%c0_66, %c0_67] : memref<1x256xf32, #tpu.memory_space<vmem>>, vector<1x256xf32>
      %147 = vector.broadcast %146 : vector<1x256xf32> to vector<8x256xf32>
      %148 = arith.addf %145, %147 : vector<8x256xf32>
      %cst_68 = arith.constant 0.000000e+00 : f32
      %149 = vector.broadcast %cst_68 : f32 to vector<8x256xf32>
      %150 = arith.maximumf %148, %149 : vector<8x256xf32>
      %c0_69 = arith.constant 0 : index
      %c0_70 = arith.constant 0 : index
      %151 = vector.load %arg21[%c0_69, %c0_70] : memref<8x256xf32, #tpu.memory_space<vmem>>, vector<8x256xf32>
      tpu.vector_store %arg21[%c0_69, %c0_70], %150 {strides = array<i32>} : memref<8x256xf32, #tpu.memory_space<vmem>>, vector<8x256xf32>,
      %152 = vector.extract_strided_slice %150 {offsets = [0, 0], sizes = [8, 128], strides = [1, 1]} : vector<8x256xf32> to vector<8x128xf32>
      %153 = vector.extract_strided_slice %150 {offsets = [0, 128], sizes = [8, 128], strides = [1, 1]} : vector<8x256xf32> to vector<8x128xf32>
      %cst_71 = arith.constant 5.000000e-01 : f32
      %154 = vector.broadcast %cst_71 : f32 to vector<8x128xf32>
      %155 = arith.mulf %154, %153 : vector<8x128xf32>
      %156 = math.exp %155 : vector<8x128xf32>
      %c0_72 = arith.constant 0 : index
      %c0_73 = arith.constant 0 : index
      %157 = vector.load %arg3[%c0_72, %c0_73] : memref<8x128xf32, #tpu.memory_space<vmem>>, vector<8x128xf32>
      %158 = arith.mulf %156, %157 : vector<8x128xf32>
      %159 = arith.addf %152, %158 : vector<8x128xf32>
      %160 = arith.truncf %159 : vector<8x128xf32> to vector<8x128xbf16>
      %c0_74 = arith.constant 0 : index
      %c0_75 = arith.constant 0 : index
      %161 = vector.load %arg14[%c0_74, %c0_75] : memref<128x128xbf16, #tpu.memory_space<vmem>>, vector<128x128xbf16>
      %cst_76 = arith.constant dense<0.000000e+00> : vector<8x128xf32>
      %162 = tpu.matmul %160, %161, %cst_76 {dimension_numbers = #tpu.dot_dimension_numbers<[1], [0], [0], [1], [0, 0, 1, 1], [], []>} : vector<8x128xbf16>, vector<128x128xbf16>, vector<8x128xf32> -> vector<8x128xf32>
      %c0_77 = arith.constant 0 : index
      %c0_78 = arith.constant 0 : index
      %163 = vector.load %arg15[%c0_77, %c0_78] : memref<1x128xf32, #tpu.memory_space<vmem>>, vector<1x128xf32>
      %164 = vector.broadcast %163 : vector<1x128xf32> to vector<8x128xf32>
      %165 = arith.addf %162, %164 : vector<8x128xf32>
      %cst_79 = arith.constant 0.000000e+00 : f32
      %166 = vector.broadcast %cst_79 : f32 to vector<8x128xf32>
      %167 = arith.maximumf %165, %166 : vector<8x128xf32>
      %168 = arith.truncf %142 : vector<8x128xf32> to vector<8x128xbf16>
      %c0_80 = arith.constant 0 : index
      %c0_81 = arith.constant 0 : index
      %169 = vector.load %arg16[%c0_80, %c0_81] : memref<128x128xbf16, #tpu.memory_space<vmem>>, vector<128x128xbf16>
      %cst_82 = arith.constant dense<0.000000e+00> : vector<8x128xf32>
      %170 = tpu.matmul %168, %169, %cst_82 {dimension_numbers = #tpu.dot_dimension_numbers<[1], [0], [0], [1], [0, 0, 1, 1], [], []>} : vector<8x128xbf16>, vector<128x128xbf16>, vector<8x128xf32> -> vector<8x128xf32>
      %171 = arith.truncf %167 : vector<8x128xf32> to vector<8x128xbf16>
      %c0_83 = arith.constant 0 : index
      %c0_84 = arith.constant 0 : index
      %172 = vector.load %arg17[%c0_83, %c0_84] : memref<128x128xbf16, #tpu.memory_space<vmem>>, vector<128x128xbf16>
      %cst_85 = arith.constant dense<0.000000e+00> : vector<8x128xf32>
      %173 = tpu.matmul %171, %172, %cst_85 {dimension_numbers = #tpu.dot_dimension_numbers<[1], [0], [0], [1], [0, 0, 1, 1], [], []>} : vector<8x128xbf16>, vector<128x128xbf16>, vector<8x128xf32> -> vector<8x128xf32>
      %174 = arith.addf %170, %173 : vector<8x128xf32>
      %c0_86 = arith.constant 0 : index
      %c0_87 = arith.constant 0 : index
      %175 = vector.load %arg18[%c0_86, %c0_87] : memref<1x128xf32, #tpu.memory_space<vmem>>, vector<1x128xf32>
      %176 = vector.broadcast %175 : vector<1x128xf32> to vector<8x128xf32>
      %177 = arith.addf %174, %176 : vector<8x128xf32>
      %c0_88 = arith.constant 0 : index
      %c0_89 = arith.constant 0 : index
      %178 = vector.load %arg22[%c0_88, %c0_89] : memref<8x128xf32, #tpu.memory_space<vmem>>, vector<8x128xf32>
      tpu.vector_store %arg22[%c0_88, %c0_89], %177 {strides = array<i32>} : memref<8x128xf32, #tpu.memory_space<vmem>>, vector<8x128xf32>,
    } else {
    }
    %c3_i32_2 = arith.constant 3 : i32
    %6 = arith.cmpi slt, %arg0, %c3_i32_2 : i32
    %c3_i32_3 = arith.constant 3 : i32
    %7 = arith.cmpi sge, %arg0, %c3_i32_3 : i32
    %8 = arith.extui %7 : i1 to i32
    %c2_i32 = arith.constant 2 : i32
    %9 = arith.minsi %arg0, %c2_i32 : i32
    %10 = arith.index_cast %9 : i32 to index
    %c0 = arith.constant 0 : index
    %c0_4 = arith.constant 0 : index
    %11 = vector.load %arg1[%10, %c0, %c0_4] : memref<4x8x2xf32, #tpu.memory_space<vmem>>, vector<1x8x2xf32>
    %12 = vector.shape_cast %11 : vector<1x8x2xf32> to vector<8x2xf32>
    %c1_i32 = arith.constant 1 : i32
    %13 = arith.addi %9, %c1_i32 : i32
    %14 = arith.index_cast %13 : i32 to index
    %c0_5 = arith.constant 0 : index
    %c0_6 = arith.constant 0 : index
    %15 = vector.load %arg1[%14, %c0_5, %c0_6] : memref<4x8x2xf32, #tpu.memory_space<vmem>>, vector<1x8x2xf32>
    %16 = vector.shape_cast %15 : vector<1x8x2xf32> to vector<8x2xf32>
    %c0_7 = arith.constant 0 : index
    %c0_8 = arith.constant 0 : index
    %c0_9 = arith.constant 0 : index
    %17 = vector.load %arg24[%c0_7, %c0_8, %c0_9] : memref<2x8x2xf32, #tpu.memory_space<vmem>>, vector<1x8x2xf32>
    %18 = vector.shape_cast %17 : vector<1x8x2xf32> to vector<8x2xf32>
    %c1 = arith.constant 1 : index
    %c0_10 = arith.constant 0 : index
    %c0_11 = arith.constant 0 : index
    %19 = vector.load %arg24[%c1, %c0_10, %c0_11] : memref<2x8x2xf32, #tpu.memory_space<vmem>>, vector<1x8x2xf32>
    %20 = vector.shape_cast %19 : vector<1x8x2xf32> to vector<8x2xf32>
    %c3_i32_12 = arith.constant 3 : i32
    %21 = arith.cmpi sgt, %arg0, %c3_i32_12 : i32
    %c0_13 = arith.constant 0 : index
    %c0_14 = arith.constant 0 : index
    %22 = vector.load %arg2[%c0_13, %c0_14] : memref<8x1xf32, #tpu.memory_space<vmem>>, vector<8x1xf32>
    %cst = arith.constant 5.000000e-01 : f32
    %23 = vector.broadcast %cst : f32 to vector<8x1xf32>
    %24 = arith.cmpf ogt, %22, %23 : vector<8x1xf32>
    %25 = vector.broadcast %21 : i1 to vector<8x1xi1>
    %26 = arith.ori %25, %24 : vector<8x1xi1>
    %27 = vector.shape_cast %26 : vector<8x1xi1> to vector<8x1xi1>
    %28 = vector.broadcast %27 : vector<8x1xi1> to vector<8x2xi1>
    %29 = arith.select %28, %18, %16 : vector<8x2xi1>, vector<8x2xf32>
    %30 = arith.select %6, %12, %29 : vector<8x2xf32>
    %31 = arith.select %6, %16, %20 : vector<8x2xf32>
    %32 = vector.extract_strided_slice %30 {offsets = [0, 0], sizes = [8, 1], strides = [1, 1]} : vector<8x2xf32> to vector<8x1xf32>
    %33 = arith.cmpf one, %32, %32 : vector<8x1xf32>
    %34 = vector.extract_strided_slice %31 {offsets = [0, 0], sizes = [8, 1], strides = [1, 1]} : vector<8x2xf32> to vector<8x1xf32>
    %35 = arith.cmpf one, %34, %34 : vector<8x1xf32>
    %36 = arith.ori %33, %35 : vector<8x1xi1>
    %cst_15 = arith.constant dense<true> : vector<8x1xi1>
    %37 = arith.xori %36, %cst_15 : vector<8x1xi1>
    %38 = arith.subf %31, %30 : vector<8x2xf32>
    %cst_16 = arith.constant 4.000000e+00 : f32
    %39 = vector.broadcast %cst_16 : f32 to vector<8x2xf32>
    %40 = arith.mulf %38, %39 : vector<8x2xf32>
    %41 = arith.truncf %40 : vector<8x2xf32> to vector<8x2xbf16>
    %c0_17 = arith.constant 0 : index
    %c0_18 = arith.constant 0 : index
    %42 = vector.load %arg5[%c0_17, %c0_18] : memref<2x64xbf16, #tpu.memory_space<vmem>>, vector<2x64xbf16>
    %cst_19 = arith.constant dense<0.000000e+00> : vector<8x64xf32>
    %43 = tpu.matmul %41, %42, %cst_19 {dimension_numbers = #tpu.dot_dimension_numbers<[1], [0], [0], [1], [0, 0, 1, 1], [], []>} : vector<8x2xbf16>, vector<2x64xbf16>, vector<8x64xf32> -> vector<8x64xf32>
    %c0_20 = arith.constant 0 : index
    %c0_21 = arith.constant 0 : index
    %44 = vector.load %arg6[%c0_20, %c0_21] : memref<1x64xf32, #tpu.memory_space<vmem>>, vector<1x64xf32>
    %45 = vector.broadcast %44 : vector<1x64xf32> to vector<8x64xf32>
    %46 = arith.addf %43, %45 : vector<8x64xf32>
    %cst_22 = arith.constant 0.000000e+00 : f32
    %47 = vector.broadcast %cst_22 : f32 to vector<8x64xf32>
    %48 = arith.maximumf %46, %47 : vector<8x64xf32>
    %c0_23 = arith.constant 0 : index
    %c0_24 = arith.constant 0 : index
    %49 = vector.load %arg22[%c0_23, %c0_24] : memref<8x128xf32, #tpu.memory_space<vmem>>, vector<8x128xf32>
    %c0_25 = arith.constant 0 : index
    %c0_26 = arith.constant 0 : index
    %50 = vector.load %arg23[%c0_25, %c0_26] : memref<8x128xf32, #tpu.memory_space<vmem>>, vector<8x128xf32>
    %51 = arith.truncf %49 : vector<8x128xf32> to vector<8x128xbf16>
    %52 = arith.index_cast %8 : i32 to index
    %c0_27 = arith.constant 0 : index
    %c0_28 = arith.constant 0 : index
    %53 = vector.load %arg7[%52, %c0_27, %c0_28] : memref<2x128x512xbf16, #tpu.memory_space<vmem>>, vector<1x128x512xbf16>
    %54 = vector.shape_cast %53 : vector<1x128x512xbf16> to vector<128x512xbf16>
    %cst_29 = arith.constant dense<0.000000e+00> : vector<8x512xf32>
    %55 = tpu.matmul %51, %54, %cst_29 {dimension_numbers = #tpu.dot_dimension_numbers<[1], [0], [0], [1], [0, 0, 1, 1], [], []>} : vector<8x128xbf16>, vector<128x512xbf16>, vector<8x512xf32> -> vector<8x512xf32>
    %56 = arith.truncf %48 : vector<8x64xf32> to vector<8x64xbf16>
    %57 = arith.index_cast %8 : i32 to index
    %c0_30 = arith.constant 0 : index
    %c0_31 = arith.constant 0 : index
    %58 = vector.load %arg8[%57, %c0_30, %c0_31] : memref<2x64x512xbf16, #tpu.memory_space<vmem>>, vector<1x64x512xbf16>
    %59 = vector.shape_cast %58 : vector<1x64x512xbf16> to vector<64x512xbf16>
    %cst_32 = arith.constant dense<0.000000e+00> : vector<8x512xf32>
    %60 = tpu.matmul %56, %59, %cst_32 {dimension_numbers = #tpu.dot_dimension_numbers<[1], [0], [0], [1], [0, 0, 1, 1], [], []>} : vector<8x64xbf16>, vector<64x512xbf16>, vector<8x512xf32> -> vector<8x512xf32>
    %61 = arith.addf %55, %60 : vector<8x512xf32>
    %62 = arith.index_cast %8 : i32 to index
    %c0_33 = arith.constant 0 : index
    %c0_34 = arith.constant 0 : index
    %63 = vector.load %arg9[%62, %c0_33, %c0_34] : memref<2x1x512xf32, #tpu.memory_space<vmem>>, vector<1x1x512xf32>
    %64 = vector.shape_cast %63 : vector<1x1x512xf32> to vector<1x512xf32>
    %65 = vector.broadcast %64 : vector<1x512xf32> to vector<8x512xf32>
    %66 = arith.addf %61, %65 : vector<8x512xf32>
    %67 = vector.extract_strided_slice %66 {offsets = [0, 0], sizes = [8, 128], strides = [1, 1]} : vector<8x512xf32> to vector<8x128xf32>
    %68 = arith.negf %67 : vector<8x128xf32>
    %69 = math.exp %68 : vector<8x128xf32>
    %cst_35 = arith.constant 1.000000e+00 : f32
    %70 = vector.broadcast %cst_35 : f32 to vector<8x128xf32>
    %71 = arith.addf %70, %69 : vector<8x128xf32>
    %72 = arith.divf %70, %71 : vector<8x128xf32>
    %73 = vector.extract_strided_slice %66 {offsets = [0, 128], sizes = [8, 128], strides = [1, 1]} : vector<8x512xf32> to vector<8x128xf32>
    %74 = arith.negf %73 : vector<8x128xf32>
    %75 = math.exp %74 : vector<8x128xf32>
    %cst_36 = arith.constant 1.000000e+00 : f32
    %76 = vector.broadcast %cst_36 : f32 to vector<8x128xf32>
    %77 = arith.addf %76, %75 : vector<8x128xf32>
    %78 = arith.divf %76, %77 : vector<8x128xf32>
    %79 = vector.extract_strided_slice %66 {offsets = [0, 256], sizes = [8, 128], strides = [1, 1]} : vector<8x512xf32> to vector<8x128xf32>
    %80 = math.tanh %79 : vector<8x128xf32>
    %81 = vector.extract_strided_slice %66 {offsets = [0, 384], sizes = [8, 128], strides = [1, 1]} : vector<8x512xf32> to vector<8x128xf32>
    %82 = arith.negf %81 : vector<8x128xf32>
    %83 = math.exp %82 : vector<8x128xf32>
    %cst_37 = arith.constant 1.000000e+00 : f32
    %84 = vector.broadcast %cst_37 : f32 to vector<8x128xf32>
    %85 = arith.addf %84, %83 : vector<8x128xf32>
    %86 = arith.divf %84, %85 : vector<8x128xf32>
    %87 = arith.mulf %78, %50 : vector<8x128xf32>
    %88 = arith.mulf %72, %80 : vector<8x128xf32>
    %89 = arith.addf %87, %88 : vector<8x128xf32>
    %90 = math.tanh %89 : vector<8x128xf32>
    %91 = arith.mulf %86, %90 : vector<8x128xf32>
    %92 = arith.truncf %91 : vector<8x128xf32> to vector<8x128xbf16>
    %c0_38 = arith.constant 0 : index
    %c0_39 = arith.constant 0 : index
    %93 = vector.load %arg10[%c0_38, %c0_39] : memref<128x8xbf16, #tpu.memory_space<vmem>>, vector<128x8xbf16>
    %cst_40 = arith.constant dense<0.000000e+00> : vector<8x8xf32>
    %94 = tpu.matmul %92, %93, %cst_40 {dimension_numbers = #tpu.dot_dimension_numbers<[1], [0], [0], [1], [0, 0, 1, 1], [], []>} : vector<8x128xbf16>, vector<128x8xbf16>, vector<8x8xf32> -> vector<8x8xf32>
    %c0_41 = arith.constant 0 : index
    %c0_42 = arith.constant 0 : index
    %95 = vector.load %arg11[%c0_41, %c0_42] : memref<1x8xf32, #tpu.memory_space<vmem>>, vector<1x8xf32>
    %96 = vector.broadcast %95 : vector<1x8xf32> to vector<8x8xf32>
    %97 = arith.addf %94, %96 : vector<8x8xf32>
    %c0_43 = arith.constant 0 : index
    %c0_44 = arith.constant 0 : index
    %98 = vector.load %arg4[%c0_43, %c0_44] : memref<3x8xf32, #tpu.memory_space<vmem>>, vector<3x8xf32>
    %99 = vector.extract_strided_slice %98 {offsets = [0, 0], sizes = [1, 8], strides = [1, 1]} : vector<3x8xf32> to vector<1x8xf32>
    %100 = vector.broadcast %99 : vector<1x8xf32> to vector<8x8xf32>
    %101 = arith.mulf %100, %97 : vector<8x8xf32>
    %102 = vector.extract_strided_slice %98 {offsets = [1, 0], sizes = [1, 8], strides = [1, 1]} : vector<3x8xf32> to vector<1x8xf32>
    %103 = vector.broadcast %102 : vector<1x8xf32> to vector<8x8xf32>
    %104 = arith.addf %101, %103 : vector<8x8xf32>
    %105 = vector.extract_strided_slice %98 {offsets = [2, 0], sizes = [1, 8], strides = [1, 1]} : vector<3x8xf32> to vector<1x8xf32>
    %106 = arith.negf %97 : vector<8x8xf32>
    %107 = math.exp %106 : vector<8x8xf32>
    %cst_45 = arith.constant 1.000000e+00 : f32
    %108 = vector.broadcast %cst_45 : f32 to vector<8x8xf32>
    %109 = arith.addf %108, %107 : vector<8x8xf32>
    %110 = arith.divf %108, %109 : vector<8x8xf32>
    %111 = vector.broadcast %105 : vector<1x8xf32> to vector<8x8xf32>
    %112 = arith.mulf %111, %110 : vector<8x8xf32>
    %113 = arith.addf %104, %112 : vector<8x8xf32>
    %cst_46 = arith.constant 0x7FC00000 : f32
    %114 = vector.shape_cast %37 : vector<8x1xi1> to vector<8x1xi1>
    %115 = vector.broadcast %114 : vector<8x1xi1> to vector<8x8xi1>
    %116 = vector.broadcast %cst_46 : f32 to vector<8x8xf32>
    %117 = arith.select %115, %113, %116 : vector<8x8xi1>, vector<8x8xf32>
    %118 = vector.extract_strided_slice %117 {offsets = [0, 0], sizes = [8, 2], strides = [1, 1]} : vector<8x8xf32> to vector<8x2xf32>
    %119 = arith.addf %31, %118 : vector<8x2xf32>
    %120 = vector.shape_cast %37 : vector<8x1xi1> to vector<8x1xi1>
    %121 = vector.broadcast %120 : vector<8x1xi1> to vector<8x128xi1>
    %122 = arith.select %121, %91, %49 : vector<8x128xi1>, vector<8x128xf32>
    %c0_47 = arith.constant 0 : index
    %c0_48 = arith.constant 0 : index
    %123 = vector.load %arg22[%c0_47, %c0_48] : memref<8x128xf32, #tpu.memory_space<vmem>>, vector<8x128xf32>
    tpu.vector_store %arg22[%c0_47, %c0_48], %122 {strides = array<i32>} : memref<8x128xf32, #tpu.memory_space<vmem>>, vector<8x128xf32>,
    %124 = vector.shape_cast %37 : vector<8x1xi1> to vector<8x1xi1>
    %125 = vector.broadcast %124 : vector<8x1xi1> to vector<8x128xi1>
    %126 = arith.select %125, %89, %50 : vector<8x128xi1>, vector<8x128xf32>
    %c0_49 = arith.constant 0 : index
    %c0_50 = arith.constant 0 : index
    %127 = vector.load %arg23[%c0_49, %c0_50] : memref<8x128xf32, #tpu.memory_space<vmem>>, vector<8x128xf32>
    tpu.vector_store %arg23[%c0_49, %c0_50], %126 {strides = array<i32>} : memref<8x128xf32, #tpu.memory_space<vmem>>, vector<8x128xf32>,
    %c0_51 = arith.constant 0 : index
    %c0_52 = arith.constant 0 : index
    %c0_53 = arith.constant 0 : index
    %128 = vector.load %arg24[%c0_51, %c0_52, %c0_53] : memref<2x8x2xf32, #tpu.memory_space<vmem>>, vector<1x8x2xf32>
    %129 = vector.shape_cast %128 : vector<1x8x2xf32> to vector<8x2xf32>
    %130 = vector.shape_cast %20 : vector<8x2xf32> to vector<1x8x2xf32>
    tpu.vector_store %arg24[%c0_51, %c0_52, %c0_53], %130 {strides = array<i32>} : memref<2x8x2xf32, #tpu.memory_space<vmem>>, vector<1x8x2xf32>,
    %c1_54 = arith.constant 1 : index
    %c0_55 = arith.constant 0 : index
    %c0_56 = arith.constant 0 : index
    %131 = vector.load %arg24[%c1_54, %c0_55, %c0_56] : memref<2x8x2xf32, #tpu.memory_space<vmem>>, vector<1x8x2xf32>
    %132 = vector.shape_cast %131 : vector<1x8x2xf32> to vector<8x2xf32>
    %133 = vector.shape_cast %119 : vector<8x2xf32> to vector<1x8x2xf32>
    tpu.vector_store %arg24[%c1_54, %c0_55, %c0_56], %133 {strides = array<i32>} : memref<2x8x2xf32, #tpu.memory_space<vmem>>, vector<1x8x2xf32>,
    %134 = arith.index_cast %arg0 : i32 to index
    %c0_57 = arith.constant 0 : index
    %c0_58 = arith.constant 0 : index
    %135 = vector.load %arg19[%134, %c0_57, %c0_58] : memref<5x8x8xf32, #tpu.memory_space<vmem>>, vector<1x8x8xf32>
    %136 = vector.shape_cast %135 : vector<1x8x8xf32> to vector<8x8xf32>
    %137 = vector.shape_cast %117 : vector<8x8xf32> to vector<1x8x8xf32>
    tpu.vector_store %arg19[%134, %c0_57, %c0_58], %137 {strides = array<i32>} : memref<5x8x8xf32, #tpu.memory_space<vmem>>, vector<1x8x8xf32>,
    %138 = arith.index_cast %arg0 : i32 to index
    %c0_59 = arith.constant 0 : index
    %c0_60 = arith.constant 0 : index
    %139 = vector.load %arg20[%138, %c0_59, %c0_60] : memref<5x8x2xf32, #tpu.memory_space<vmem>>, vector<1x8x2xf32>
    %140 = vector.shape_cast %139 : vector<1x8x2xf32> to vector<8x2xf32>
    %141 = vector.shape_cast %119 : vector<8x2xf32> to vector<1x8x2xf32>
    tpu.vector_store %arg20[%138, %c0_59, %c0_60], %141 {strides = array<i32>} : memref<5x8x2xf32, #tpu.memory_space<vmem>>, vector<1x8x2xf32>,
    return
  }
  func.func @transform_0(%arg0: i32) -> (i32, i32, i32) {
    %c0_i32 = arith.constant 0 : i32
    %c0_i32_0 = arith.constant 0 : i32
    %c0_i32_1 = arith.constant 0 : i32
    %c0_i32_2 = arith.constant 0 : i32
    return %c0_i32, %c0_i32_0, %c0_i32_1 : i32, i32, i32
  }
  func.func @transform_1(%arg0: i32) -> (i32, i32) {
    %c0_i32 = arith.constant 0 : i32
    %c0_i32_0 = arith.constant 0 : i32
    %c0_i32_1 = arith.constant 0 : i32
    return %c0_i32, %c0_i32_0 : i32, i32
  }
  func.func @transform_2(%arg0: i32) -> (i32, i32) {
    %c0_i32 = arith.constant 0 : i32
    %c0_i32_0 = arith.constant 0 : i32
    %c0_i32_1 = arith.constant 0 : i32
    return %c0_i32, %c0_i32_0 : i32, i32
  }
  func.func @transform_3(%arg0: i32) -> (i32, i32) {
    %c0_i32 = arith.constant 0 : i32
    %c0_i32_0 = arith.constant 0 : i32
    %c0_i32_1 = arith.constant 0 : i32
    return %c0_i32, %c0_i32_0 : i32, i32
  }
  func.func @transform_4(%arg0: i32) -> (i32, i32) {
    %c0_i32 = arith.constant 0 : i32
    %c0_i32_0 = arith.constant 0 : i32
    %c0_i32_1 = arith.constant 0 : i32
    return %c0_i32, %c0_i32_0 : i32, i32
  }
  func.func @transform_5(%arg0: i32) -> (i32, i32) {
    %c0_i32 = arith.constant 0 : i32
    %c0_i32_0 = arith.constant 0 : i32
    %c0_i32_1 = arith.constant 0 : i32
    return %c0_i32, %c0_i32_0 : i32, i32
  }
  func.func @transform_6(%arg0: i32) -> (i32, i32, i32) {
    %c0_i32 = arith.constant 0 : i32
    %c0_i32_0 = arith.constant 0 : i32
    %c0_i32_1 = arith.constant 0 : i32
    %c0_i32_2 = arith.constant 0 : i32
    return %c0_i32, %c0_i32_0, %c0_i32_1 : i32, i32, i32
  }
  func.func @transform_7(%arg0: i32) -> (i32, i32, i32) {
    %c0_i32 = arith.constant 0 : i32
    %c0_i32_0 = arith.constant 0 : i32
    %c0_i32_1 = arith.constant 0 : i32
    %c0_i32_2 = arith.constant 0 : i32
    return %c0_i32, %c0_i32_0, %c0_i32_1 : i32, i32, i32
  }
  func.func @transform_8(%arg0: i32) -> (i32, i32, i32) {
    %c0_i32 = arith.constant 0 : i32
    %c0_i32_0 = arith.constant 0 : i32
    %c0_i32_1 = arith.constant 0 : i32
    %c0_i32_2 = arith.constant 0 : i32
    return %c0_i32, %c0_i32_0, %c0_i32_1 : i32, i32, i32
  }
  func.func @transform_9(%arg0: i32) -> (i32, i32) {
    %c0_i32 = arith.constant 0 : i32
    %c0_i32_0 = arith.constant 0 : i32
    %c0_i32_1 = arith.constant 0 : i32
    return %c0_i32, %c0_i32_0 : i32, i32
  }
  func.func @transform_10(%arg0: i32) -> (i32, i32) {
    %c0_i32 = arith.constant 0 : i32
    %c0_i32_0 = arith.constant 0 : i32
    %c0_i32_1 = arith.constant 0 : i32
    return %c0_i32, %c0_i32_0 : i32, i32
  }
  func.func @transform_11(%arg0: i32) -> (i32, i32) {
    %c0_i32 = arith.constant 0 : i32
    %c0_i32_0 = arith.constant 0 : i32
    %c0_i32_1 = arith.constant 0 : i32
    return %c0_i32, %c0_i32_0 : i32, i32
  }
  func.func @transform_12(%arg0: i32) -> (i32, i32) {
    %c0_i32 = arith.constant 0 : i32
    %c0_i32_0 = arith.constant 0 : i32
    %c0_i32_1 = arith.constant 0 : i32
    return %c0_i32, %c0_i32_0 : i32, i32
  }
  func.func @transform_13(%arg0: i32) -> (i32, i32) {
    %c0_i32 = arith.constant 0 : i32
    %c0_i32_0 = arith.constant 0 : i32
    %c0_i32_1 = arith.constant 0 : i32
    return %c0_i32, %c0_i32_0 : i32, i32
  }
  func.func @transform_14(%arg0: i32) -> (i32, i32) {
    %c0_i32 = arith.constant 0 : i32
    %c0_i32_0 = arith.constant 0 : i32
    %c0_i32_1 = arith.constant 0 : i32
    return %c0_i32, %c0_i32_0 : i32, i32
  }
  func.func @transform_15(%arg0: i32) -> (i32, i32) {
    %c0_i32 = arith.constant 0 : i32
    %c0_i32_0 = arith.constant 0 : i32
    %c0_i32_1 = arith.constant 0 : i32
    return %c0_i32, %c0_i32_0 : i32, i32
  }
  func.func @transform_16(%arg0: i32) -> (i32, i32) {
    %c0_i32 = arith.constant 0 : i32
    %c0_i32_0 = arith.constant 0 : i32
    %c0_i32_1 = arith.constant 0 : i32
    return %c0_i32, %c0_i32_0 : i32, i32
  }
  func.func @transform_17(%arg0: i32) -> (i32, i32) {
    %c0_i32 = arith.constant 0 : i32
    %c0_i32_0 = arith.constant 0 : i32
    %c0_i32_1 = arith.constant 0 : i32
    return %c0_i32, %c0_i32_0 : i32, i32
  }
  func.func @transform_18(%arg0: i32) -> (i32, i32, i32) {
    %c0_i32 = arith.constant 0 : i32
    %c0_i32_0 = arith.constant 0 : i32
    %c0_i32_1 = arith.constant 0 : i32
    %c0_i32_2 = arith.constant 0 : i32
    return %c0_i32, %c0_i32_0, %c0_i32_1 : i32, i32, i32
  }
  func.func @transform_19(%arg0: i32) -> (i32, i32, i32) {
    %c0_i32 = arith.constant 0 : i32
    %c0_i32_0 = arith.constant 0 : i32
    %c0_i32_1 = arith.constant 0 : i32
    %c0_i32_2 = arith.constant 0 : i32
    return %c0_i32, %c0_i32_0, %c0_i32_1 : i32, i32, i32
  }
  func.func @transform_20(%arg0: i32) -> (i32, i32) {
    %c0_i32 = arith.constant 0 : i32
    %c0_i32_0 = arith.constant 0 : i32
    %c0_i32_1 = arith.constant 0 : i32
    return %c0_i32, %c0_i32_0 : i32, i32
  }
}

</mosaic_0001>

<bundles_post_ra>
// kernel: vae_forward.1
= control target key start
LH: loop header
LB: loop body
LE: loop exit
PB: predicated region body
PF: predicated region fallthrough
CT: control target
= control target key end

     0   :  { %s3296_s0 = inlined_call_operand.vmem [shape: f32[4,8,2], index: 0, kind: input, shape index: {}]   ;;  %s3297_s1 = inlined_call_operand.vmem [shape: f32[8,1], index: 1, kind: input, shape index: {}]   ;;  %s3298_s2 = inlined_call_operand.vmem [shape: f32[8,128], index: 2, kind: input, shape index: {}]   ;;  %s3299_s3 = inlined_call_operand.vmem [shape: f32[3,8], index: 3, kind: input, shape index: {}]   ;;  %s3300_s4 = inlined_call_operand.vmem [shape: bf16[2,64], index: 4, kind: input, shape index: {}]   ;;  %s3301_s5 = inlined_call_operand.vmem [shape: f32[1,64], index: 5, kind: input, shape index: {}]   ;;  %s3302_s6 = inlined_call_operand.hbm [shape: bf16[2,128,512], index: 6, kind: input, shape index: {}]   ;;  %s3303_s7 = inlined_call_operand.hbm [shape: bf16[2,64,512], index: 7, kind: input, shape index: {}]   ;;  %s3304_s8 = inlined_call_operand.vmem [shape: f32[2,1,512], index: 8, kind: input, shape index: {}]   ;;  %s3305_s9 = inlined_call_operand.vmem [shape: bf16[128,8], index: 9, kind: input, shape index: {}]   ;;  %s3306_s10 = inlined_call_operand.vmem [shape: f32[1,8], index: 10, kind: input, shape index: {}]   ;;  %s3307_s11 = inlined_call_operand.vmem [shape: bf16[128,256], index: 11, kind: input, shape index: {}]   ;;  %s3308_s12 = inlined_call_operand.vmem [shape: f32[1,256], index: 12, kind: input, shape index: {}]   ;;  %s3309_s13 = inlined_call_operand.hbm [shape: bf16[128,128], index: 13, kind: input, shape index: {}]   ;;  %s3310_s14 = inlined_call_operand.vmem [shape: f32[1,128], index: 14, kind: input, shape index: {}]   ;;  %s3311_s15 = inlined_call_operand.hbm [shape: bf16[128,128], index: 15, kind: input, shape index: {}]   ;;  %s3312_s16 = inlined_call_operand.hbm [shape: bf16[128,128], index: 16, kind: input, shape index: {}]   ;;  %s3313_s17 = inlined_call_operand.vmem [shape: f32[1,128], index: 17, kind: input, shape index: {}]   ;;  %s3314_s18 = inlined_call_operand.hbm [shape: f32[5,8,8], index: 18, kind: output, shape index: {0}]   ;;  %s3315_s19 = inlined_call_operand.vmem [shape: f32[5,8,2], index: 19, kind: output, shape index: {1}]   ;;  %s3316_s20 = inlined_call_operand.hbm [shape: f32[8,256], index: 20, kind: output, shape index: {2}]  }
   0x1   :  { %3321 = sst [smem:[#allocation22_spill]] %s3296_s0 }
   0x2   :  { %3322 = sst [smem:[#allocation23_spill]] %s3297_s1 }
   0x3   :  { %3323 = sst [smem:[#allocation24_spill]] %s3298_s2 }
   0x4   :  { %3324 = sst [smem:[#allocation25_spill]] %s3299_s3 }
   0x5   :  { %3325 = sst [smem:[#allocation26_spill]] %s3300_s4 }
   0x6   :  { %3326 = sst [smem:[#allocation27_spill]] %s3303_s7 }
   0x7   :  { %26 = vsyncpa [#allocation6], 0 }
   0x8   :  { %27 = vsyncpa [#allocation9], 0 }
   0x9   :  { %28 = vsyncpa [#allocation12], 0 }
   0xa   :  { %29 = vsyncpa [#allocation7], 0 }
   0xb   :  { %30 = vsyncpa [#allocation16], 0  ;;  %s2902_s1 = smov 0  }
   0xc LB: > { %s2908_s22 = sadd.s32 4294967295, %s2774_s1   ;;  %p2070_p0 = scmp.ge.s32.totalorder %s2774_s1, 1  ;;  %s2774_s1 = sphi %s2902_s1, %s36_s1  }
   0xd   : > { %p482_p1 = scmp.lt.s32.totalorder %s2774_s1, 6  ;;  %p2376_p3 = scmp.eq.s32.totalorder %s2908_s22, 0 }
   0xe   : > { %s2776_s24 = smov [#allocation8]   ;;  %s2777_s3 = smov [#allocation11]  }
   0xf   : > { %p2914_p4 = pnand %p2070_p0, %p482_p1  ;;  %s525_s2 = sshll.u32 %s2776_s24, 4  ;;  %s526_s2 = int_to_ptr.vmem [resolvable:$true] %s525_s2 }
  0x10   : > { %s569_s26 = sshll.u32 %s2777_s3, 4  ;;  %s2778_s27 = smov [#allocation5]   ;;  %s2926_s26 = int_to_ptr.vmem [resolvable:$true] %s569_s26 }
  0x11   : > { %p2360_p5 = pneg %p2914_p4  ;;  %s512_s28 = sshll.u32 %s2778_s27, 4  ;;  %s2928_s28 = int_to_ptr.vmem [resolvable:$true] %s512_s28 }
  0x12   : > { %s2581_s29 = scalar_lea.vmem %s526_s2, 4096  ;;  %p2589_p11 = scmp.lt.s32.totalorder %s526_s2, %s526_s2 }
  0x13   : > { %p2922_p6 = pnand %p2376_p3, %p2360_p5  ;;  %p2582_p8 = scmp.ne.s32.totalorder %s526_s2, %s2581_s29 }
  0x14   : > { %p2590_p12 = scmp.lt.s32.totalorder %s2581_s29, %s2581_s29 }
  0x15   : > { %p2932_p7 = pneg %p2922_p6 }
  0x16   : > { %p2591_p13 = por %p2590_p12, %p2589_p11 }
  0x17   : > { %p2584_p9 = pnand %p2582_p8, %p2932_p7 }
  0x19   : > { %p2585_p10 = pneg %p2584_p9 }
  0x1b   : > { %p2592_p0 = pnand %p2591_p13, %p2585_p10 }
  0x1d   : > { %2595 = shalt.err (!%p2592_p0)
}
  0x1e   : > { %s2779_s30 = smov 256   ;;  %s2780_s0 = smov 16  }
  0x1f   : > { %s3330_s7 = sld [smem:[#allocation27_spill]]  ;;  %s2607_s3 = scalar_lea.vmem %s2926_s26, 1024 }
  0x20   : > { %p2608_p1 = scmp.ne.s32.totalorder %s2926_s26, %s2607_s3  ;;  %p2615_p9 = scmp.lt.s32.totalorder %s2926_s26, %s2926_s26 }
  0x21   : > { %p2616_p10 = scmp.lt.s32.totalorder %s2607_s3, %s2607_s3 }
  0x22   : > { %p2610_p5 = pnand %p2608_p1, %p2932_p7 }
  0x23   : > { %p2617_p11 = por %p2616_p10, %p2615_p9 }
  0x24   : > { %p2611_p8 = pneg %p2610_p5 }
  0x25   : > { %2366 = dma.hbm_to_vmem [thread:$0]  (!%p2922_p6), %s3330_s7, 4096, %s526_s2, [#allocation9], %s2779_s30, %s2779_s30, %s2780_s0  }
  0x26   : > { %p2618_p12 = pnand %p2617_p11, %p2611_p8 }
  0x28   : > { %2621 = shalt.err (!%p2618_p12)
}
  0x29   : > { %s3317_s27 = smov 64   ;;  %s3319_s29 = smov 4  }
  0x2a   : > { %2372 = dma.hbm_to_vmem [thread:$0]  (!%p2922_p6), %s3311_s15, 1024, %s2926_s26, [#allocation12], %s3317_s27, %s3317_s27, %s3319_s29  }
  0x2b   : > { %s2633_s24 = scalar_lea.vmem %s2928_s28, 8192  ;;  %p2641_p5 = scmp.lt.s32.totalorder %s2928_s28, %s2928_s28 }
  0x2c   : > { %p2634_p13 = scmp.ne.s32.totalorder %s2928_s28, %s2633_s24  ;;  %p2642_p8 = scmp.lt.s32.totalorder %s2633_s24, %s2633_s24 }
  0x2e   : > { %p2636_p0 = pnand %p2634_p13, %p2932_p7  ;;  %p2643_p9 = por %p2642_p8, %p2641_p5 }
  0x30   : > { %p2637_p1 = pneg %p2636_p0 }
  0x32   : > { %p2644_p10 = pnand %p2643_p9, %p2637_p1 }
  0x34   : > { %2647 = shalt.err (!%p2644_p10)
}
  0x35   : > { %2363 = dma.hbm_to_vmem [thread:$0]  (!%p2922_p6), %s3302_s6, 8192, %s2928_s28, [#allocation6], %s2779_s30, %s2779_s30, %s2780_s0  }
  0x36   : > { %s2783_s26 = smov [#allocation10]   ;;  %s2784_s21 = smov [#allocation13]  }
  0x37   : > { %s553_s2 = sshll.u32 %s2783_s26, 4  ;;  %s582_s27 = sshll.u32 %s2784_s21, 4  ;;  %s554_s2 = int_to_ptr.vmem [resolvable:$true] %s553_s2  ;;  %s583_s27 = int_to_ptr.vmem [resolvable:$true] %s582_s27 }
  0x38   : > { %s2659_s29 = scalar_lea.vmem %s554_s2, 1024  ;;  %p2667_p0 = scmp.lt.s32.totalorder %s554_s2, %s554_s2 }
  0x39   : > { %p2660_p11 = scmp.ne.s32.totalorder %s554_s2, %s2659_s29  ;;  %p2668_p1 = scmp.lt.s32.totalorder %s2659_s29, %s2659_s29 }
  0x3b   : > { %p2662_p12 = pnand %p2660_p11, %p2932_p7  ;;  %p2669_p5 = por %p2668_p1, %p2667_p0 }
  0x3d   : > { %p2663_p13 = pneg %p2662_p12 }
  0x3f   : > { %p2670_p8 = pnand %p2669_p5, %p2663_p13 }
  0x41   : > { %2673 = shalt.err (!%p2670_p8)
}
  0x42   : > { %s3331_s7 = smov 4   ;;  %s3332_s28 = smov 64  }
  0x43   : > { %2369 = dma.hbm_to_vmem [thread:$0]  (!%p2922_p6), %s3309_s13, 1024, %s554_s2, [#allocation9], %s3332_s28, %s3332_s28, %s3331_s7  }
  0x44   : > { %s2685_s24 = scalar_lea.vmem %s583_s27, 1024  ;;  %p2693_p12 = scmp.lt.s32.totalorder %s583_s27, %s583_s27 }
  0x45   : > { %p2686_p9 = scmp.ne.s32.totalorder %s583_s27, %s2685_s24  ;;  %p2694_p2 = scmp.lt.s32.totalorder %s2685_s24, %s2685_s24 }
  0x47   : > { %p2688_p10 = pnand %p2686_p9, %p2932_p7  ;;  %p2695_p0 = por %p2694_p2, %p2693_p12 }
  0x49   : > { %p2689_p11 = pneg %p2688_p10 }
  0x4b   : > { %p2696_p13 = pnand %p2695_p0, %p2689_p11 }
  0x4d   : > { %2699 = shalt.err (!%p2696_p13)
}
  0x4e   : > { %2375 = dma.hbm_to_vmem [thread:$0]  (!%p2922_p6), %s3312_s16, 1024, %s583_s27, [#allocation12], %s3332_s28, %s3332_s28, %s3331_s7  }
  0x4f   : > { %601 = sbr.rel (%p2914_p4) target bundleno = 1626 (0x65a), region = 92 }
  0x54   : > { %2753 = dma.done.wait (%p2376_p3), [#allocation6], 8192  }
  0x55   : > { %2755 = vsyncadd (%p2376_p3), [#allocation6], 4294959104 }
  0x56   : > { %2757 = dma.done.wait (%p2376_p3), [#allocation9], 5120  }
  0x57   : > { %2759 = vsyncadd (%p2376_p3), [#allocation9], 4294962176 }
  0x58   : > { %2761 = dma.done.wait (%p2376_p3), [#allocation12], 2048  }
  0x59   : > { %2763 = vsyncadd (%p2376_p3), [#allocation12], 4294965248  ;;  %p3333_p2 = scmp.ne.s32.totalorder %s2908_s22, 0 }
  0x5b   : > { %669 = sbr.rel (%p3333_p2) target bundleno = 99 (0x63), region = 116 }
  0x60   : > { %vm672_vm0 = vcmask 15360   ;;  %v2785_v0 = vmov 0.0  }
  0x61   : > { %670 = vst [vmem:[#allocation2] sm:$0xff] %v2785_v0  ;;  %671 = vst [vmem:[#allocation3] sm:$0xff] %v2785_v0 }
  0x62   : > { %673 = vst.msk [vmem:[#allocation4] sm:$0xff] %vm672_vm0, %v2785_v0  ;;  %674 = vst.msk [vmem:[#allocation4 + $0x8] sm:$0xff] %vm672_vm0, %v2785_v0 }
  0x63 PF: > { %p2083_p4 = scmp.ne.s32.totalorder %s2908_s22, 3 }
  0x64   : > { %s3334_s28 = sld [smem:[#allocation24_spill]] (!%p2083_p4) }
  0x65   : > { %678 = sbr.rel (%p2083_p4) target bundleno = 761 (0x2f9), region = 120 }
  0x6a   : > { %v2419_v1 = vld [vmem:[%s3307_s11 + $0x74] ss:$8 sps:$4 sm:$0xff]   ;;  %v2421_v2 = vld [vmem:[%s3307_s11 + $0x70] ss:$8 sps:$4 sm:$0xff]   ;;  %v2786_v3 = vmov 0   ;;  %v2787_v4 = vmov 0.0   ;;  %v699_v35 = vlaneseq }
  0x6b   : > { %821 = vmatprep.mubr.bf16.mxu0 %v2786_v3  ;;  %2246 = vmatprep.subr.bf16.mxu1 %v2787_v4  ;;  %v2422_v5 = vld [vmem:[%s3307_s11 + $0x64] ss:$8 sps:$4 sm:$0xff]   ;;  %v2424_v6 = vld [vmem:[%s3307_s11 + $0x60] ss:$8 sps:$4 sm:$0xff]   ;;  %v2425_v7 = vld [vmem:[%s3307_s11 + $0x54] ss:$8 sps:$4 sm:$0xff]  }
  0x6c   : > { %789 = vmatprep.subr.bf16.mxu0 %v2419_v1  ;;  %v2427_v8 = vld [vmem:[%s3307_s11 + $0x50] ss:$8 sps:$4 sm:$0xff]   ;;  %v2428_v9 = vld [vmem:[%s3307_s11 + $0x44] ss:$8 sps:$4 sm:$0xff]   ;;  %v2430_v10 = vld [vmem:[%s3307_s11 + $0x40] ss:$8 sps:$4 sm:$0xff]  }
  0x6d   : > { %790 = vmatpush1.bf16.msra.mxu0 %v2421_v2  ;;  %v2431_v11 = vld [vmem:[%s3307_s11 + $0x34] ss:$8 sps:$4 sm:$0xff]   ;;  %v2433_v12 = vld [vmem:[%s3307_s11 + $0x30] ss:$8 sps:$4 sm:$0xff]   ;;  %v2434_v13 = vld [vmem:[%s3307_s11 + $0x24] ss:$8 sps:$4 sm:$0xff]  }
  0x6e   : > { %791 = vmatprep.subr.bf16.mxu0 %v2422_v5  ;;  %v2436_v14 = vld [vmem:[%s3307_s11 + $0x20] ss:$8 sps:$4 sm:$0xff]   ;;  %v2437_v15 = vld [vmem:[%s3307_s11 + $0x14] ss:$8 sps:$4 sm:$0xff]   ;;  %v2439_v16 = vld [vmem:[%s3307_s11 + $0x10] ss:$8 sps:$4 sm:$0xff]  }
  0x6f   : > { %v2440_v17 = vld [vmem:[%s3307_s11 + $0x4] ss:$8 sps:$4 sm:$0xff]   ;;  %v2442_v18 = vld [vmem:[%s3307_s11] ss:$8 sps:$4 sm:$0xff]   ;;  %v2443_v21 = vld [vmem:[#allocation10 + $0x38] sm:$0xff]   ;;  %vm2788_vm1 = vmmov 0  }
  0x70   : > { %v679_v19 = vld [vmem:[#allocation2] sm:$0xff]  ;;  %2247 = vmatpush3.bf16.msra.mxu1 %v2443_v21  ;;  %v2444_v22 = vld [vmem:[#allocation10 + $0x30] sm:$0xff]   ;;  %v2445_v23 = vld [vmem:[#allocation10 + $0x28] sm:$0xff]   ;;  %2262 = vmatprep.mubr.msk.bf16.mxu1 %vm2788_vm1, %v2787_v4  ;;  %v700_v36 = vshrl.u32 %v699_v35, 7 }
  0x71   : > { %792 = vmatpush1.bf16.msra.mxu0 %v2424_v6  ;;  %v3056_v20 = vpack.c.bf16 %v679_v19, %v679_v19  ;;  %2248 = vmatprep.subr.bf16.mxu1 %v2787_v4  ;;  %v2446_v24 = vld [vmem:[#allocation10 + $0x20] sm:$0xff]   ;;  %v2447_v25 = vld [vmem:[#allocation10 + $0x18] sm:$0xff]   ;;  %v2448_v26 = vld [vmem:[#allocation10 + $0x10] sm:$0xff]  }
  0x72   : > { %793 = vmatprep.subr.bf16.mxu0 %v2425_v7  ;;  %v2449_v27 = vld [vmem:[#allocation10 + $0x8] sm:$0xff]   ;;  %v2450_v28 = vld [vmem:[#allocation10] sm:$0xff]   ;;  %v2453_v29 = vld [vmem:[#allocation13 + $0x38] sm:$0xff]   ;;  %v701_v37 = vsub.s32 0, %v700_v36  ;;  %v705_v39 = vsub.s32 1, %v700_v36 }
  0x73   : > { %v2455_v30 = vld [vmem:[#allocation13 + $0x30] sm:$0xff]   ;;  %v2457_v31 = vld [vmem:[#allocation13 + $0x28] sm:$0xff]   ;;  %v2459_v32 = vld [vmem:[#allocation13 + $0x20] sm:$0xff]  }
  0x74   : > { %2249 = vmatpush3.bf16.msra.mxu1 %v2444_v22  ;;  %v2461_v33 = vld [vmem:[#allocation13 + $0x18] sm:$0xff]   ;;  %v2463_v34 = vld [vmem:[#allocation13 + $0x10] sm:$0xff]   ;;  %v697_v38 = vld [vmem:[%s3308_s12] sm:$0x3] }
  0x75   : > { %794 = vmatpush1.bf16.msra.mxu0 %v2427_v8  ;;  %2250 = vmatprep.subr.bf16.mxu1 %v2787_v4  ;;  %v702_v40 = vrot.slane %v697_v38, %v701_v37  ;;  %v706_v41 = vrot.slane %v697_v38, %v705_v39  ;;  %v837_v52 = vld [vmem:[%s3334_s28] sm:$0xff]  ;;  %v2451_v56 = vld [vmem:[#allocation11 + $0x38] sm:$0xff]   ;;  %v2452_v58 = vld [vmem:[#allocation11 + $0x30] sm:$0xff]  }
  0x76   : > { %795 = vmatprep.subr.bf16.mxu0 %v2428_v9  ;;  %v2454_v59 = vld [vmem:[#allocation11 + $0x28] sm:$0xff]   ;;  %v2456_v60 = vld [vmem:[#allocation11 + $0x20] sm:$0xff]   ;;  %v2458_v61 = vld [vmem:[#allocation11 + $0x18] sm:$0xff]  }
  0x77   : > { %v2460_v62 = vld [vmem:[#allocation11 + $0x10] sm:$0xff]   ;;  %v2462_v63 = vld [vmem:[#allocation11 + $0x8] sm:$0xff]   ;;  %v2464_v0 = vld [vmem:[#allocation11] sm:$0xff]  }
  0x78   : > { %2251 = vmatpush3.bf16.msra.mxu1 %v2445_v23  ;;  %v2465_v1 = vld [vmem:[#allocation13 + $0x8] sm:$0xff]   ;;  %v2466_v2 = vld [vmem:[#allocation13] sm:$0xff]  }
  0x79   : > { %796 = vmatpush1.bf16.msra.mxu0 %v2430_v10  ;;  %2252 = vmatprep.subr.bf16.mxu1 %v2787_v4  ;;  %v2100_v3 = vld [vmem:[%s3310_s14] ss:$0 sm:$0xff] }
  0x7a   : > { %797 = vmatprep.subr.bf16.mxu0 %v2431_v11 }
  0x7c   : > { %2253 = vmatpush3.bf16.msra.mxu1 %v2446_v24 }
  0x7d   : > { %798 = vmatpush1.bf16.msra.mxu0 %v2433_v12  ;;  %2254 = vmatprep.subr.bf16.mxu1 %v2787_v4 }
  0x7e   : > { %799 = vmatprep.subr.bf16.mxu0 %v2434_v13 }
  0x80   : > { %2255 = vmatpush3.bf16.msra.mxu1 %v2447_v25 }
  0x81   : > { %800 = vmatpush1.bf16.msra.mxu0 %v2436_v14  ;;  %2256 = vmatprep.subr.bf16.mxu1 %v2787_v4 }
  0x82   : > { %801 = vmatprep.subr.bf16.mxu0 %v2437_v15 }
  0x84   : > { %2257 = vmatpush3.bf16.msra.mxu1 %v2448_v26 }
  0x85   : > { %802 = vmatpush1.bf16.msra.mxu0 %v2439_v16  ;;  %2258 = vmatprep.subr.bf16.mxu1 %v2787_v4 }
  0x86   : > { %803 = vmatprep.subr.bf16.mxu0 %v2440_v17 }
  0x88   : > { %2259 = vmatpush3.bf16.msra.mxu1 %v2449_v27 }
  0x89   : > { %804 = vmatpush1.bf16.msra.mxu0 %v2442_v18  ;;  %2260 = vmatprep.subr.bf16.mxu1 %v2787_v4 }
  0x8a   : > { %2266 = vmatprep.subr.bf16.mxu0 %v2787_v4 }
  0x8c   : > { %822 = vmatmul.mubr.bf16.vlgmr.msra.gmra.mxu0 %v3056_v20  ;;  %2261 = vmatpush3.bf16.msra.mxu1 %v2450_v28 }
  0x8d   : > { %2282 = vmatprep.mubr.msk.bf16.mxu0 %vm2788_vm1, %v2787_v4  ;;  %2286 = vmatprep.subr.bf16.mxu1 %v2787_v4 }
  0x8e   : > { %2267 = vmatpush3.bf16.msra.mxu0 %v2453_v29 }
  0x8f   : > { %2268 = vmatprep.subr.bf16.mxu0 %v2787_v4 }
  0x92   : > { %2269 = vmatpush3.bf16.msra.mxu0 %v2455_v30 }
  0x93   : > { %2270 = vmatprep.subr.bf16.mxu0 %v2787_v4 }
  0x96   : > { %2271 = vmatpush3.bf16.msra.mxu0 %v2457_v31 }
  0x97   : > { %2272 = vmatprep.subr.bf16.mxu0 %v2787_v4 }
  0x9a   : > { %2273 = vmatpush3.bf16.msra.mxu0 %v2459_v32 }
  0x9b   : > { %2274 = vmatprep.subr.bf16.mxu0 %v2787_v4 }
  0x9e   : > { %2275 = vmatpush3.bf16.msra.mxu0 %v2461_v33 }
  0x9f   : > { %2276 = vmatprep.subr.bf16.mxu0 %v2787_v4 }
  0xa2   : > { %2277 = vmatpush3.bf16.msra.mxu0 %v2463_v34 }
  0xa3   : > { %2278 = vmatprep.subr.bf16.mxu0 %v2787_v4 }
  0xa6   : > { %2279 = vmatpush3.bf16.msra.mxu0 %v2465_v1 }
  0xa7   : > { %2280 = vmatprep.subr.bf16.mxu0 %v2787_v4 }
  0xaa   : > { %2281 = vmatpush3.bf16.msra.mxu0 %v2466_v2 }
 0x14c   : > { %v823_v42 = vpop.f32.mrf.mxu0 }
 0x14d   : > { %v824_v43 = vadd.f32 %v823_v42, %v702_v40 }
 0x14e   : > { %v825_v44 = vpop.f32.mrf.mxu0 }
 0x14f   : > { %v830_v45 = vmax.f32 %v824_v43, 0.0  ;;  %v826_v46 = vadd.f32 %v825_v44, %v706_v41 }
 0x150   : > { %v827_v47 = vpop.f32.mrf.mxu0 }
 0x151   : > { %832 = vst [vmem:[#allocation15] sm:$0xff] %v830_v45  ;;  %v831_v48 = vmax.f32 %v826_v46, 0.0 }
 0x152   : > { %v828_v49 = vpop.f32.mrf.mxu0 }
 0x153   : > { %833 = vst [vmem:[#allocation15 + $0x8] sm:$0xff] %v831_v48  ;;  %v834_v50 = vmul.f32 0.5, %v831_v48 }
 0x155   : > { %v835_v51 = vmul.f32 1.442695, %v834_v50 }
 0x157   : > { %2467 = vpow2.f32 %v835_v51 }
 0x164   : > { %v2468_v53 = vpop.eup %2467 }
 0x165   : > { %v838_v54 = vmul.f32 %v2468_v53, %v837_v52 }
 0x167   : > { %v839_v55 = vadd.f32 %v838_v54, %v830_v45 }
 0x169   : > { %v840_v57 = vpack.c.bf16 %v839_v55, %v839_v55 }
 0x16b   : > { %2263 = vmatmul.mubr.bf16.vlgmr.msra.gmra.mxu1 %v840_v57 }
 0x16c   : > { %2287 = vmatpush3.bf16.msra.mxu1 %v2451_v56  ;;  %2302 = vmatprep.mubr.msk.bf16.mxu1 %vm2788_vm1, %v2787_v4 }
 0x16d   : > { %2288 = vmatprep.subr.bf16.mxu1 %v2787_v4 }
 0x170   : > { %2289 = vmatpush3.bf16.msra.mxu1 %v2452_v58 }
 0x171   : > { %2290 = vmatprep.subr.bf16.mxu1 %v2787_v4 }
 0x174   : > { %2291 = vmatpush3.bf16.msra.mxu1 %v2454_v59 }
 0x175   : > { %2292 = vmatprep.subr.bf16.mxu1 %v2787_v4 }
 0x178   : > { %2293 = vmatpush3.bf16.msra.mxu1 %v2456_v60 }
 0x179   : > { %2294 = vmatprep.subr.bf16.mxu1 %v2787_v4 }
 0x17c   : > { %2295 = vmatpush3.bf16.msra.mxu1 %v2458_v61 }
 0x17d   : > { %2296 = vmatprep.subr.bf16.mxu1 %v2787_v4 }
 0x180   : > { %2297 = vmatpush3.bf16.msra.mxu1 %v2460_v62 }
 0x181   : > { %2298 = vmatprep.subr.bf16.mxu1 %v2787_v4 }
 0x184   : > { %2299 = vmatpush3.bf16.msra.mxu1 %v2462_v63 }
 0x185   : > { %2300 = vmatprep.subr.bf16.mxu1 %v2787_v4  ;;  %v2125_v4 = vld [vmem:[%s3313_s17] ss:$0 sm:$0xff] }
 0x188   : > { %2301 = vmatpush3.bf16.msra.mxu1 %v2464_v0 }
 0x18b   : > { %2303 = vmatmul.mubr.bf16.vlgmr.msra.gmra.mxu1 %v3056_v20 }
 0x22b   : > { %v946_v5 = vpop.f32.mrf.mxu1 }
 0x22c   : > { %v947_v6 = vadd.f32 %v2100_v3, %v946_v5 }
 0x22d   : > { %v2264_v7 = vpop.f32.mrf.mxu1 }
 0x22e   : > { %v952_v8 = vmax.f32 %v947_v6, 0.0 }
 0x22f   : > { %v949_v9 = vpop.f32.mrf.mxu1 }
 0x230   : > { %v969_v10 = vpack.c.bf16 %v952_v8, %v952_v8 }
 0x231   : > { %v2265_v11 = vpop.f32.mrf.mxu1 }
 0x232   : > { %2283 = vmatmul.mubr.bf16.vlgmr.msra.gmra.mxu0 %v969_v10 }
 0x24b   : > { %v1156_v12 = vpop.f32.mrf.mxu1 }
 0x24d   : > { %v2304_v13 = vpop.f32.mrf.mxu1 }
 0x24f   : > { %v1159_v14 = vpop.f32.mrf.mxu1 }
 0x251   : > { %v2305_v15 = vpop.f32.mrf.mxu1 }
 0x2f2   : > { %v1068_v16 = vpop.f32.mrf.mxu0 }
 0x2f3   : > { %v1157_v17 = vadd.f32 %v1156_v12, %v1068_v16 }
 0x2f4   : > { %v2284_v18 = vpop.f32.mrf.mxu0 }
 0x2f5   : > { %v1169_v19 = vadd.f32 %v2125_v4, %v1157_v17 }
 0x2f6   : > { %v1071_v20 = vpop.f32.mrf.mxu0 }
 0x2f7   : > { %1170 = vst [vmem:[#allocation2] sm:$0xff] %v1169_v19 }
 0x2f8   : > { %v2285_v21 = vpop.f32.mrf.mxu0 }
 0x2f9 PF: > { %p1186_p3 = scmp.gt.s32.totalorder %s2908_s22, 3  ;;  %s3335_s25 = sld [smem:[#allocation23_spill]]  ;;  %v2789_v23 = vmov 0   ;;  %vm1223_vm5 = vcmask 1040384   ;;  %v2790_v27 = vmov 0.0   ;;  %v1183_v29 = vld [vmem:[#allocation4] sm:$0xff] }
 0x2fa   : > { %2469 = vset.pattern.permute.xlu0 %v2789_v23  ;;  %1684 = vmatprep.mubr.bf16.mxu1 %v2789_v23  ;;  %s3336_s2 = sld [smem:[#allocation26_spill]]  ;;  %v1185_v30 = vld [vmem:[#allocation4 + $0x8] sm:$0xff]  ;;  %vm1219_vm6 = vcmask 15360   ;;  %vm2791_vm7 = vmmov 0   ;;  %p1174_p6 = scmp.lt.s32.totalorder %s2908_s22, 2  ;;  %vm2792_vm13 = vmmov 1  }
 0x2fb   : > { %s1189_s4 = scalar_select %p1186_p3, 1, 0  ;;  %2306 = vmatprep.subr.bf16.mxu0 %v2790_v27  ;;  %2308 = vmatprep.mubr.msk.bf16.mxu0 %vm2791_vm7, %v2790_v27  ;;  %1932 = vst.msk [vmem:[#allocation4] sm:$0xff] %vm1219_vm6, %v1185_v30  ;;  %v2129_v6 = vld [vmem:[%s3301_s5] ss:$0 sm:$0xff]  ;;  %vm1406_vm15 = vcmask 523264  }
 0x2fc   : > { %p1171_p7 = scmp.lt.s32.totalorder %s2908_s22, 3  ;;  %s3337_s24 = sld [smem:[#allocation22_spill]] }
 0x2fd   : > { %v1190_v24 = vstv %s1189_s4  ;;  %s1175_s21 = scalar_select %p1174_p6, %s2908_s22, 2 }
 0x2fe   : > { %vm1191_vm3 = vcmp.eq.s32.totalorder %v1190_v24, 1  ;;  %s1199_s7 = scalar_select %p1171_p7, 1, 0  ;;  %v3163_v3 = vld [vmem:[#allocation2] sm:$0xff] }
 0x2ff   : > { %v1187_v22 = vld [vmem:[%s3335_s25] sm:$0xff]  ;;  %s2126_s28 = sshll.u32 %s1175_s21, 3  ;;  %p1172_p1 = scmp.ge.s32.totalorder %s2908_s22, 3  ;;  %v1270_v5 = vpack.c.bf16 %v3163_v3, %v3163_v3 }
 0x300   : > { %vm1188_vm2 = vcmp.gt.f32.partialorder %v1187_v22, 0.5  ;;  %v1211_v26 = vld [vmem:[%s3336_s2] sm:$0x1]  ;;  %v1200_v31 = vstv %s1199_s7  ;;  %p2386_p5 = scmp.eq.s32.totalorder %s2908_s22, 4 }
 0x301   : > { %vm1192_vm4 = vmor %vm1191_vm3, %vm1188_vm2  ;;  %v1225_v28 = vsel %vm1223_vm5, %v1211_v26, 0  ;;  %vm1201_vm8 = vcmp.eq.s32.totalorder %v1200_v31, 1  ;;  %s3127_s3 = scalar_select %p1172_p1, 1, 0 }
 0x302   : > { %v1193_v25 = vsel %vm1192_vm4, 1, %v2789_v23  ;;  %2307 = vmatpush3.bf16.msra.mxu0 %v1225_v28  ;;  %s1177_s29 = scalar_lea.vmem %s3337_s24, %s2126_s28 }
 0x303   : > { %1195 = vperm.xlu0 %2469, %v1193_v25   ;;  %v2128_v32 = vld [vmem:[%s1177_s29 + $0x8] sm:$0xff]  ;;  %v1178_v35 = vld [vmem:[%s1177_s29] sm:$0xff]  ;;  %s2206_s23 = sshll.u32 %s3127_s3, 8  ;;  %s2207_s4 = sshll.u32 %s3127_s3, 7 }
 0x304   : > { %v3121_v33 = vsel %vm1201_vm8, %v2128_v32, %v1185_v30  ;;  %s3132_s25 = scalar_lea.vmem [#allocation5], %s2206_s23  ;;  %s3141_s27 = scalar_lea.vmem [#allocation8], %s2207_s4 }
 0x305   : > { %vm1205_vm10 = vcmp.ne.f32.partialorder %v3121_v33, %v3121_v33  ;;  %v2470_v42 = vld [vmem:[%s3132_s25 + $0xe4] ss:$16 sps:$4 sm:$0xff]   ;;  %v2472_v43 = vld [vmem:[%s3132_s25 + $0xe0] ss:$16 sps:$4 sm:$0xff]   ;;  %v2508_v2 = vld [vmem:[%s3141_s27 + $0x6c] ss:$16 sps:$4 sm:$0xff]  }
 0x306   : > { %1652 = vmatprep.subr.bf16.mxu1 %v2470_v42  ;;  %v2473_v44 = vld [vmem:[%s3132_s25 + $0xc4] ss:$16 sps:$4 sm:$0xff]   ;;  %v2475_v45 = vld [vmem:[%s3132_s25 + $0xc0] ss:$16 sps:$4 sm:$0xff]   ;;  %v2506_v12 = vld [vmem:[%s3141_s27 + $0x68] ss:$16 sps:$4 sm:$0xff]  }
 0x307   : > { %1653 = vmatpush1.bf16.msra.mxu1 %v2472_v43  ;;  %v2476_v46 = vld [vmem:[%s3132_s25 + $0xa4] ss:$16 sps:$4 sm:$0xff]   ;;  %v2482_v47 = vld [vmem:[%s3141_s27 + $0x60] ss:$16 sps:$4 sm:$0xff]   ;;  %v2511_v14 = vld [vmem:[%s3141_s27 + $0x4c] ss:$16 sps:$4 sm:$0xff]  }
 0x308   : > { %1654 = vmatprep.subr.bf16.mxu1 %v2473_v44  ;;  %v2484_v48 = vld [vmem:[%s3141_s27 + $0x64] ss:$16 sps:$4 sm:$0xff]   ;;  %v2478_v49 = vld [vmem:[%s3132_s25 + $0xa0] ss:$16 sps:$4 sm:$0xff]   ;;  %v2509_v16 = vld [vmem:[%s3141_s27 + $0x48] ss:$16 sps:$4 sm:$0xff]  }
 0x309   : > { %v2479_v50 = vld [vmem:[%s3132_s25 + $0x84] ss:$16 sps:$4 sm:$0xff]   ;;  %1418 = vmatprep.subr.bf16.mxu0 %v2484_v48  ;;  %v2488_v51 = vld [vmem:[%s3141_s27 + $0x40] ss:$16 sps:$4 sm:$0xff]   ;;  %v2514_v4 = vld [vmem:[%s3141_s27 + $0x2c] ss:$16 sps:$4 sm:$0xff]  }
 0x30a   : > { %v2490_v52 = vld [vmem:[%s3141_s27 + $0x44] ss:$16 sps:$4 sm:$0xff]   ;;  %v2481_v53 = vld [vmem:[%s3132_s25 + $0x80] ss:$16 sps:$4 sm:$0xff]   ;;  %v2512_v17 = vld [vmem:[%s3141_s27 + $0x28] ss:$16 sps:$4 sm:$0xff]  }
 0x30b   : > { %1655 = vmatpush1.bf16.msra.mxu1 %v2475_v45  ;;  %v2485_v54 = vld [vmem:[%s3132_s25 + $0x64] ss:$16 sps:$4 sm:$0xff]   ;;  %v2494_v56 = vld [vmem:[%s3141_s27 + $0x20] ss:$16 sps:$4 sm:$0xff]   ;;  %v2517_v18 = vld [vmem:[%s3141_s27 + $0xc] ss:$16 sps:$4 sm:$0xff]  }
 0x30c   : > { %1656 = vmatprep.subr.bf16.mxu1 %v2476_v46  ;;  %v2496_v55 = vld [vmem:[%s3141_s27 + $0x24] ss:$16 sps:$4 sm:$0xff]   ;;  %v2487_v57 = vld [vmem:[%s3132_s25 + $0x60] ss:$16 sps:$4 sm:$0xff]   ;;  %v2515_v19 = vld [vmem:[%s3141_s27 + $0x8] ss:$16 sps:$4 sm:$0xff]  }
 0x30d   : > { %v2491_v58 = vld [vmem:[%s3132_s25 + $0x44] ss:$16 sps:$4 sm:$0xff]   ;;  %v2493_v59 = vld [vmem:[%s3132_s25 + $0x40] ss:$16 sps:$4 sm:$0xff]   ;;  %v2520_v20 = vld [vmem:[%s3132_s25 + $0xec] ss:$16 sps:$4 sm:$0xff]  }
 0x30e   : > { %v2497_v60 = vld [vmem:[%s3132_s25 + $0x24] ss:$16 sps:$4 sm:$0xff]   ;;  %v2499_v61 = vld [vmem:[%s3132_s25 + $0x20] ss:$16 sps:$4 sm:$0xff]   ;;  %v2518_v21 = vld [vmem:[%s3132_s25 + $0xe8] ss:$16 sps:$4 sm:$0xff]  }
 0x30f   : > { %1657 = vmatpush1.bf16.msra.mxu1 %v2478_v49  ;;  %v2502_v62 = vld [vmem:[%s3141_s27 + $0x4] ss:$16 sps:$4 sm:$0xff]   ;;  %v2500_v63 = vld [vmem:[%s3141_s27] ss:$16 sps:$4 sm:$0xff]   ;;  %v2523_v22 = vld [vmem:[%s3132_s25 + $0xcc] ss:$16 sps:$4 sm:$0xff]  }
 0x310   : > { %1658 = vmatprep.subr.bf16.mxu1 %v2479_v50  ;;  %v2503_v0 = vld [vmem:[%s3132_s25 + $0x4] ss:$16 sps:$4 sm:$0xff]   ;;  %v2505_v1 = vld [vmem:[%s3132_s25] ss:$16 sps:$4 sm:$0xff]   ;;  %v2521_v24 = vld [vmem:[%s3132_s25 + $0xc8] ss:$16 sps:$4 sm:$0xff]  }
 0x311   : > { %v2526_v25 = vld [vmem:[%s3132_s25 + $0xac] ss:$16 sps:$4 sm:$0xff]   ;;  %v2524_v26 = vld [vmem:[%s3132_s25 + $0xa8] ss:$16 sps:$4 sm:$0xff]   ;;  %v2543_v43 = vld [vmem:[%s3305_s9 + $0x30] sm:$0xff]   ;;  %s2185_s30 = sshll.u32 %s3127_s3, 2 }
 0x312   : > { %v2529_v28 = vld [vmem:[%s3132_s25 + $0x8c] ss:$16 sps:$4 sm:$0xff]   ;;  %v2530_v31 = vld [vmem:[%s3132_s25 + $0x68] ss:$16 sps:$4 sm:$0xff]   ;;  %v2545_v45 = vld [vmem:[%s3305_s9 + $0x20] sm:$0xff]   ;;  %s1735_s29 = scalar_lea.vmem %s3304_s8, %s2185_s30  ;;  %s2793_s3 = smov [#allocation15]  }
 0x313   : > { %1659 = vmatpush1.bf16.msra.mxu1 %v2481_v53  ;;  %v2532_v30 = vld [vmem:[%s3132_s25 + $0x6c] ss:$16 sps:$4 sm:$0xff]   ;;  %v2549_v49 = vld [vmem:[%s3305_s9] sm:$0xff]   ;;  %s1963_s23 = sshll.u32 %s2793_s3, 4  ;;  %s1964_s23 = int_to_ptr.vmem [resolvable:$true] %s1963_s23 }
 0x314   : > { %1660 = vmatprep.subr.bf16.mxu1 %v2485_v54  ;;  %v2542_v42 = vld [vmem:[%s3305_s9 + $0x38] sm:$0xff]   ;;  %v2544_v44 = vld [vmem:[%s3305_s9 + $0x28] sm:$0xff]   ;;  %v1738_v54 = vlaneseq  ;;  %p2707_p11 = scmp.lt.s32.totalorder %s1964_s23, %s1964_s23 }
 0x315   : > { %v2546_v46 = vld [vmem:[%s3305_s9 + $0x18] sm:$0xff]   ;;  %v2548_v48 = vld [vmem:[%s3305_s9 + $0x8] sm:$0xff]  }
 0x317   : > { %1661 = vmatpush1.bf16.msra.mxu1 %v2487_v57 }
 0x318   : > { %1662 = vmatprep.subr.bf16.mxu1 %v2491_v58 }
 0x31b   : > { %1663 = vmatpush1.bf16.msra.mxu1 %v2493_v59  ;;  %v1736_v59 = vld [vmem:[%s1735_s29] sm:$0xf] }
 0x31c   : > { %1664 = vmatprep.subr.bf16.mxu1 %v2497_v60 }
 0x31f   : > { %1665 = vmatpush1.bf16.msra.mxu1 %v2499_v61 }
 0x320   : > { %1666 = vmatprep.subr.bf16.mxu1 %v2503_v0 }
 0x323   : > { %1667 = vmatpush1.bf16.msra.mxu1 %v2505_v1 }
 0x324   : > { %2312 = vmatprep.subr.bf16.mxu1 %v2790_v27 }
 0x326   : > { %1685 = vmatmul.mubr.bf16.vlgmr.msra.gmra.mxu1 %v1270_v5 }
 0x327   : > { %2328 = vmatprep.mubr.msk.bf16.mxu1 %vm2791_vm7, %v2790_v27  ;;  %2313 = vmatpush3.bf16.msra.mxu1 %v2542_v42 }
 0x328   : > { %2314 = vmatprep.subr.bf16.mxu1 %v2790_v27 }
 0x32b   : > { %2315 = vmatpush3.bf16.msra.mxu1 %v2543_v43 }
 0x32c   : > { %2316 = vmatprep.subr.bf16.mxu1 %v2790_v27 }
 0x32f   : > { %2317 = vmatpush3.bf16.msra.mxu1 %v2544_v44 }
 0x330   : > { %2318 = vmatprep.subr.bf16.mxu1 %v2790_v27 }
 0x333   : > { %2319 = vmatpush3.bf16.msra.mxu1 %v2545_v45 }
 0x334   : > { %2320 = vmatprep.subr.bf16.mxu1 %v2790_v27 }
 0x337   : > { %2321 = vmatpush3.bf16.msra.mxu1 %v2546_v46 }
 0x338   : > { %2322 = vmatprep.subr.bf16.mxu1 %v2790_v27 }
 0x37e   : > { %v1196_v34 = vpop.permute.xlu0 %1195 }
 0x37f   : > { %vm1197_vm9 = vcmp.eq.s32.totalorder %v1196_v34, 1  ;;  %v2538_v34 = vld [vmem:[%s3132_s25 + $0x2c] ss:$16 sps:$4 sm:$0xff]  }
 0x380   : > { %v1198_v36 = vsel %vm1197_vm9, %v1183_v29, %v2128_v32  ;;  %v2527_v29 = vld [vmem:[%s3132_s25 + $0x88] ss:$16 sps:$4 sm:$0xff]   ;;  %v2535_v32 = vld [vmem:[%s3132_s25 + $0x4c] ss:$16 sps:$4 sm:$0xff]  }
 0x381   : > { %v1202_v37 = vsel %vm1201_vm8, %v1178_v35, %v1198_v36  ;;  %v2536_v35 = vld [vmem:[%s3132_s25 + $0x28] ss:$16 sps:$4 sm:$0xff]   ;;  %v2541_v36 = vld [vmem:[%s3132_s25 + $0xc] ss:$16 sps:$4 sm:$0xff]  }
 0x382   : > { %v1208_v38 = vsub.f32 %v3121_v33, %v1202_v37  ;;  %vm1204_vm11 = vcmp.ne.f32.partialorder %v1202_v37, %v1202_v37  ;;  %v2539_v37 = vld [vmem:[%s3132_s25 + $0x8] ss:$16 sps:$4 sm:$0xff]  }
 0x383   : > { %vm1206_vm12 = vmor %vm1204_vm11, %vm1205_vm10 }
 0x384   : > { %v1209_v39 = vmul.f32 4.0, %v1208_v38  ;;  %vm1207_vm14 = vmxor %vm1206_vm12, %vm2792_vm13 }
 0x385   : > { %v1921_v40 = vsel %vm1207_vm14, 1, %v2789_v23 }
 0x386   : > { %v1210_v41 = vpack.c.bf16 %v1209_v39, %v1209_v39  ;;  %1923 = vperm.xlu0 %2469, %v1921_v40  }
 0x388   : > { %2309 = vmatmul.mubr.msk.bf16.vlgmr.msra.gmra.mxu0 %vm1219_vm6, %v1210_v41 }
 0x389   : > { %1442 = vmatprep.mubr.bf16.mxu0 %v2789_v23  ;;  %1419 = vmatpush1.bf16.msra.mxu0 %v2482_v47  ;;  %v2547_v47 = vld [vmem:[%s3305_s9 + $0x10] sm:$0xff]  }
 0x38a   : > { %1420 = vmatprep.subr.bf16.mxu0 %v2490_v52  ;;  %2323 = vmatpush3.bf16.msra.mxu1 %v2547_v47 }
 0x38b   : > { %2324 = vmatprep.subr.bf16.mxu1 %v2790_v27 }
 0x38d   : > { %1421 = vmatpush1.bf16.msra.mxu0 %v2488_v51 }
 0x38e   : > { %1422 = vmatprep.subr.bf16.mxu0 %v2496_v55  ;;  %2325 = vmatpush3.bf16.msra.mxu1 %v2548_v48  ;;  %v3232_v55 = vshrl.u32 %v1738_v54, 7 }
 0x38f   : > { %2326 = vmatprep.subr.bf16.mxu1 %v2790_v27 }
 0x390   : > { %v1740_v57 = vsub.s32 0, %v3232_v55 }
 0x391   : > { %1423 = vmatpush1.bf16.msra.mxu0 %v2494_v56  ;;  %v1744_v56 = vsub.s32 1, %v3232_v55 }
 0x392   : > { %1424 = vmatprep.subr.bf16.mxu0 %v2502_v62  ;;  %2327 = vmatpush3.bf16.msra.mxu1 %v2549_v49 }
 0x393   : > { %v1745_v61 = vrot.slane %v1736_v59, %v1744_v56 }
 0x395   : > { %1425 = vmatpush1.bf16.msra.mxu0 %v2500_v63  ;;  %v1741_v63 = vrot.slane %v1736_v59, %v1740_v57 }
 0x396   : > { %1459 = vmatprep.subr.bf16.mxu0 %v2508_v2 }
 0x3e6   : > { %v1686_v38 = vpop.f32.mrf.mxu1 }
 0x3e8   : > { %v1688_v39 = vpop.f32.mrf.mxu1 }
 0x3ea   : > { %v1690_v40 = vpop.f32.mrf.mxu1 }
 0x3ec   : > { %v1691_v41 = vpop.f32.mrf.mxu1 }
 0x448   : > { %v1261_v7 = vpop.f32.mrf.mxu0 }
 0x449   : > { %v1262_v8 = vadd.f32 %v2129_v6, %v1261_v7 }
 0x44a   : > { %v2310_v9 = vpop.f32.mrf.mxu0 }
 0x44b   : > { %v1267_v10 = vmax.f32 %v1262_v8, 0.0  ;;  %v1748_v8 = vsub.s32 2, %v3232_v55 }
 0x44c   : > { %v1264_v11 = vpop.f32.mrf.mxu0 }
 0x44d   : > { %v1306_v13 = vpack.c.bf16 %v1267_v10, %v1267_v10  ;;  %v1752_v11 = vsub.s32 3, %v3232_v55 }
 0x44e   : > { %v2311_v15 = vpop.f32.mrf.mxu0 }
 0x44f   : > { %2151 = vmatmul.mubr.msk.bf16.vlgmr.msra.gmra.mxu0 %vm1406_vm15, %v1306_v13 }
 0x450   : > { %1460 = vmatpush1.bf16.msra.mxu0 %v2506_v12  ;;  %1483 = vmatprep.mubr.bf16.mxu0 %v2789_v23 }
 0x451   : > { %1461 = vmatprep.subr.bf16.mxu0 %v2511_v14 }
 0x454   : > { %1462 = vmatpush1.bf16.msra.mxu0 %v2509_v16 }
 0x455   : > { %1463 = vmatprep.subr.bf16.mxu0 %v2514_v4  ;;  %v1753_v4 = vrot.slane %v1736_v59, %v1752_v11 }
 0x458   : > { %1464 = vmatpush1.bf16.msra.mxu0 %v2512_v17 }
 0x459   : > { %1465 = vmatprep.subr.bf16.mxu0 %v2517_v18 }
 0x45c   : > { %1466 = vmatpush1.bf16.msra.mxu0 %v2515_v19 }
 0x45d   : > { %1693 = vmatprep.subr.bf16.mxu0 %v2520_v20 }
 0x45f   : > { %2152 = vmatmul.mubr.msk.bf16.vlgmr.msra.gmra.mxu0 %vm1406_vm15, %v1306_v13  ;;  %v1749_v13 = vrot.slane %v1736_v59, %v1748_v8 }
 0x460   : > { %1694 = vmatpush1.bf16.msra.mxu0 %v2518_v21  ;;  %1725 = vmatprep.mubr.bf16.mxu0 %v2789_v23  ;;  %v2533_v23 = vld [vmem:[%s3132_s25 + $0x48] ss:$16 sps:$4 sm:$0xff]   ;;  %s2700_s25 = scalar_lea.vmem %s1964_s23, 256 }
 0x461   : > { %1695 = vmatprep.subr.bf16.mxu0 %v2523_v22  ;;  %p2701_p8 = scmp.ne.s32.totalorder %s1964_s23, %s2700_s25  ;;  %p2708_p12 = scmp.lt.s32.totalorder %s2700_s25, %s2700_s25 }
 0x463   : > { %p2702_p9 = pnand %p2701_p8, %p2386_p5  ;;  %p2709_p0 = por %p2708_p12, %p2707_p11 }
 0x464   : > { %1696 = vmatpush1.bf16.msra.mxu0 %v2521_v24 }
 0x465   : > { %1697 = vmatprep.subr.bf16.mxu0 %v2526_v25  ;;  %p2703_p10 = pneg %p2702_p9 }
 0x467   : > { %p2710_p13 = pnand %p2709_p0, %p2703_p10 }
 0x468   : > { %1698 = vmatpush1.bf16.msra.mxu0 %v2524_v26  ;;  %v1269_v26 = vld [vmem:[#allocation3] sm:$0xff] }
 0x469   : > { %1699 = vmatprep.subr.bf16.mxu0 %v2529_v28 }
 0x46c   : > { %1700 = vmatpush1.bf16.msra.mxu0 %v2527_v29 }
 0x46d   : > { %1701 = vmatprep.subr.bf16.mxu0 %v2532_v30  ;;  %v1924_v30 = vpop.permute.xlu0 %1923 }
 0x46e   : > { %vm1925_vm0 = vcmp.eq.s32.totalorder %v1924_v30, 1 }
 0x470   : > { %1702 = vmatpush1.bf16.msra.mxu0 %v2530_v31 }
 0x471   : > { %1703 = vmatprep.subr.bf16.mxu0 %v2535_v32 }
 0x474   : > { %1704 = vmatpush1.bf16.msra.mxu0 %v2533_v23 }
 0x475   : > { %1705 = vmatprep.subr.bf16.mxu0 %v2538_v34 }
 0x478   : > { %1706 = vmatpush1.bf16.msra.mxu0 %v2536_v35 }
 0x479   : > { %1707 = vmatprep.subr.bf16.mxu0 %v2541_v36 }
 0x47c   : > { %1708 = vmatpush1.bf16.msra.mxu0 %v2539_v37 }
 0x47f   : > { %1726 = vmatmul.mubr.bf16.vlgmr.msra.gmra.mxu0 %v1270_v5 }
 0x50f   : > { %v1444_v50 = vpop.f32.mrf.mxu0 }
 0x510   : > { %v1687_v62 = vadd.f32 %v1686_v38, %v1444_v50 }
 0x511   : > { %v1446_v51 = vpop.f32.mrf.mxu0 }
 0x512   : > { %v1689_v60 = vadd.f32 %v1688_v39, %v1446_v51  ;;  %v1758_v5 = vadd.f32 %v1741_v63, %v1687_v62 }
 0x513   : > { %v1448_v52 = vpop.f32.mrf.mxu0 }
 0x514   : > { %v1759_v2 = vadd.f32 %v1745_v61, %v1689_v60  ;;  %v2186_v7 = vmul.f32 -1.442695, %v1758_v5 }
 0x515   : > { %v1449_v53 = vpop.f32.mrf.mxu0 }
 0x516   : > { %v2187_v6 = vmul.f32 -1.442695, %v1759_v2 }
 0x518   : > { %2550 = vpow2.f32 %v2187_v6 }
 0x519   : > { %2552 = vpow2.f32 %v2186_v7 }
 0x51f   : > { %v1485_v58 = vpop.f32.mrf.mxu0 }
 0x521   : > { %v1487_v27 = vpop.f32.mrf.mxu0 }
 0x523   : > { %v1489_v0 = vpop.f32.mrf.mxu0 }
 0x525   : > { %v1490_v1 = vpop.f32.mrf.mxu0  ;;  %v2551_v9 = vpop.eup %2550 }
 0x526   : > { %v2553_v10 = vpop.eup %2552  ;;  %v1771_v12 = vadd.f32 1.0, %v2551_v9 }
 0x527   : > { %v1765_v14 = vadd.f32 1.0, %v2553_v10 }
 0x528   : > { %2554 = vrcp.f32 %v1771_v12 }
 0x529   : > { %2556 = vrcp.f32 %v1765_v14 }
 0x535   : > { %v2555_v25 = vpop.eup %2554 }
 0x536   : > { %v2557_v28 = vpop.eup %2556  ;;  %v1781_v31 = vmul.f32 %v2555_v25, %v1269_v26 }
 0x53f   : > { %v1727_v15 = vpop.f32.mrf.mxu0 }
 0x540   : > { %v1728_v16 = vadd.f32 %v1727_v15, %v1485_v58 }
 0x541   : > { %v1729_v17 = vpop.f32.mrf.mxu0 }
 0x542   : > { %v1760_v18 = vadd.f32 %v1749_v13, %v1728_v16  ;;  %v1730_v19 = vadd.f32 %v1729_v17, %v1487_v27 }
 0x543   : > { %v1731_v20 = vpop.f32.mrf.mxu0 }
 0x544   : > { %2558 = vtanh.f32 %v1760_v18  ;;  %v1761_v21 = vadd.f32 %v1753_v4, %v1730_v19 }
 0x545   : > { %v1732_v22 = vpop.f32.mrf.mxu0 }
 0x546   : > { %v2188_v24 = vmul.f32 -1.442695, %v1761_v21 }
 0x548   : > { %2560 = vpow2.f32 %v2188_v24 }
 0x551   : > { %v2559_v29 = vpop.eup %2558 }
 0x552   : > { %v1782_v32 = vmul.f32 %v2559_v29, %v2557_v28 }
 0x554   : > { %v1783_v23 = vadd.f32 %v1782_v32, %v1781_v31 }
 0x555   : > { %v2561_v34 = vpop.eup %2560 }
 0x556   : > { %v1930_v35 = vsel %vm1925_vm0, %v1783_v23, %v1269_v26  ;;  %v1778_v36 = vadd.f32 1.0, %v2561_v34  ;;  %2562 = vtanh.f32 %v1783_v23 }
 0x557   : > { %1931 = vst [vmem:[#allocation3] sm:$0xff] %v1930_v35 }
 0x558   : > { %2564 = vrcp.f32 %v1778_v36 }
 0x563   : > { %v2563_v37 = vpop.eup %2562 }
 0x565   : > { %v2565_v38 = vpop.eup %2564 }
 0x566   : > { %v1785_v39 = vmul.f32 %v2565_v38, %v2563_v37 }
 0x568   : > { %v1786_v40 = vpack.c.bf16 %v1785_v39, %v1785_v39  ;;  %v1928_v41 = vsel %vm1925_vm0, %v1785_v39, %v3163_v3 }
 0x569   : > { %1929 = vst [vmem:[#allocation2] sm:$0xff] %v1928_v41 }
 0x56a   : > { %2329 = vmatmul.mubr.bf16.vlgmr.msra.gmra.mxu1 %v1786_v40 }
 0x56b   : > { %2713 = shalt.err (!%p2710_p13)
}
 0x56c   : > { %2355 = dma.vmem_to_hbm [thread:$0]  (%p2386_p5), %s1964_s23, 256, %s3316_s20, [#allocation16]   ;;  %v2189_v3 = vld [vmem:[%s3306_s10] ss:$0 sm:$0xff]  ;;  %vm1936_vm1 = vcmask 64512  }
 0x56d   : > { %s3338_s28 = sld [smem:[#allocation25_spill]]  ;;  %s2199_s30 = sshll.u32 %s2908_s22, 3 }
 0x56e   : > { %s2794_s0 = smov [#allocation14]   ;;  %s1938_s23 = scalar_lea.vmem %s3315_s19, %s2199_s30 }
 0x56f   : > { %s1946_s24 = sshll.u32 %s2794_s0, 4  ;;  %s1935_s25 = scalar_lea.vmem [#allocation14], %s2199_s30  ;;  %s1947_s24 = int_to_ptr.vmem [resolvable:$true] %s1946_s24 }
 0x570   : > { %s2724_s4 = scalar_lea.vmem %s1947_s24, 640  ;;  %p2731_p6 = scmp.lt.s32.totalorder %s1947_s24, %s1947_s24 }
 0x571   : > { %p2725_p2 = scmp.ne.s32.totalorder %s1947_s24, %s2724_s4  ;;  %p2732_p7 = scmp.lt.s32.totalorder %s2724_s4, %s2724_s4 }
 0x573   : > { %v1898_v50 = vld [vmem:[%s3338_s28] sm:$0x7]  ;;  %p2726_p4 = pnand %p2725_p2, %p2386_p5  ;;  %p2733_p1 = por %p2732_p7, %p2731_p6 }
 0x574   : > { %v1902_v51 = vrot.slane %v1898_v50, %v1740_v57  ;;  %v1907_v53 = vrot.slane %v1898_v50, %v1744_v56  ;;  %v1918_v54 = vrot.slane %v1898_v50, %v1748_v8 }
 0x575   : > { %p2727_p3 = pneg %p2726_p4 }
 0x577   : > { %p2734_p8 = pnand %p2733_p1, %p2727_p3 }
 0x62a   : > { %v1892_v42 = vpop.f32.mrf.mxu1 }
 0x62b   : > { %v1893_v43 = vadd.f32 %v2189_v3, %v1892_v42 }
 0x62c   : > { %v2330_v44 = vpop.f32.mrf.mxu1 }
 0x62d   : > { %v2198_v45 = vmul.f32 -1.442695, %v1893_v43  ;;  %v1903_v52 = vmul.f32 %v1902_v51, %v1893_v43 }
 0x62e   : > { %v1895_v46 = vpop.f32.mrf.mxu1 }
 0x62f   : > { %2566 = vpow2.f32 %v2198_v45  ;;  %v1908_v59 = vadd.f32 %v1907_v53, %v1903_v52 }
 0x630   : > { %v2331_v47 = vpop.f32.mrf.mxu1 }
 0x63c   : > { %v2567_v48 = vpop.eup %2566 }
 0x63d   : > { %v1912_v49 = vadd.f32 1.0, %v2567_v48 }
 0x63f   : > { %2568 = vrcp.f32 %v1912_v49 }
 0x64c   : > { %v2569_v58 = vpop.eup %2568 }
 0x64d   : > { %v1919_v27 = vmul.f32 %v2569_v58, %v1918_v54 }
 0x64f   : > { %v1920_v60 = vadd.f32 %v1919_v27, %v1908_v59 }
 0x651   : > { %v1926_v61 = vsel %vm1925_vm0, %v1920_v60, nan }
 0x652   : > { %v1927_v56 = vadd.f32 %v1926_v61, %v3121_v33  ;;  %1937 = vst.msk [vmem:[%s1935_s25] sm:$0xff] %vm1936_vm1, %v1926_v61 }
 0x653   : > { %2737 = shalt.err (!%p2734_p8)
}
 0x654   : > { %s2795_s27 = smov 128   ;;  %s2796_s26 = smov 8   ;;  %1933 = vst.msk [vmem:[#allocation4 + $0x8] sm:$0xff] %vm1219_vm6, %v1927_v56  ;;  %1939 = vst.msk [vmem:[%s1938_s23] sm:$0xff] %vm1219_vm6, %v1927_v56 }
 0x655   : > { %2353 = dma.vmem_to_hbm [thread:$0]  (%p2386_p5), %s1947_s24, 640, %s3314_s18, [#allocation7], %s2795_s27, %s2795_s27, %s2796_s26  }
 0x656   : > { %2765 = dma.done.wait (%p2386_p5), [#allocation7], 640  }
 0x657   : > { %2767 = vsyncadd (%p2386_p5), [#allocation7], 4294966656 }
 0x658   : > { %2769 = dma.done.wait (%p2386_p5), [#allocation16], 256  }
 0x659   : > { %2771 = vsyncadd (%p2386_p5), [#allocation16], 4294967040 }
 0x65a PF: > { %s36_s1 = sadd.s32 1, %s2774_s1  }
 0x65b   : > { %p33_p9 = scmp.ge.s32.totalorder %s36_s1, 7  }
 0x65d   :  { %35 = sbr.rel (!%p33_p9) target bundleno = 12 (0xc), region = 169 }
 0x662   :  { %1983 = vsyncpa [#allocation6], 1 }
 0x663   :  { %1985 = vsyncpa [#allocation6 + $0x1], 1 }
 0x664   :  { %1986 = vsyncpa [#allocation9], 1 }
 0x665   :  { %1987 = vsyncpa [#allocation12], 1 }
 0x666   :  { %1988 = vsyncpa [#allocation7], 1 }
 0x667   :  { %1990 = vsyncpa [#allocation7 + $0x1], 1 }
 0x668   :  { %1991 = vsyncpa [#allocation16], 1 }

</bundles_post_ra>
